<compile_context>
chip_gen: v5e
topology: v5e:2x2
jax: 0.10.0
libtpu: 0.0.40
codegen_flags: <defaults>
</compile_context>

<pallas_src>
import functools

import jax
import jax.numpy as jnp
import numpy as np
from jax import lax
from jax.experimental import pallas as pl
from jax.experimental.pallas import tpu as pltpu

_QL = 128                              # lane-padded twin-Q output width (q1=lane0, q2=lane1)
_VMEM_BUDGET = 24 * 1024 * 1024        # conservative per-step VMEM budget (fits every gen)
_VMEM_DEFAULT_SAFE = 14 * 1024 * 1024  # below v5e's 16 MiB default scoped limit


def _round_up(x, m):
    return ((x + m - 1) // m) * m


def _is_v7x():
    try:
        return "7" in jax.devices()[0].device_kind
    except Exception:
        return False


def _build_kernel(T, bt, H, cdt):
    """cdt: compute dtype for the batched (non-recurrent) matmul operands."""

    unroll = True if T <= 16 else 8

    def kernel(
        # per-batch-tile sequence inputs, rows are time-major: row = t*bt + b
        a_ref, r_ref, o_ref, ca_ref,
        # embedders (Linear + ReLU)
        wa_ref, ba_ref, wr_ref, br_ref, wo_ref, bo_ref,
        # GRU input-side weights, gates fused along lanes (order r, z, n);
        # bih has bhh_r / bhh_z already folded in
        wih_a_ref, wih_r_ref, wih_o_ref, bih_ref,
        # GRU hidden-side weights, one (H, H) matrix per gate (lane-aligned)
        whh_r_ref, whh_z_ref, whh_n_ref, bhh_n_ref,
        # shortcut embedder cat([obs, act]) split into obs / act pieces
        wsc_o_ref, wsc_a_ref, bsc_ref,
        # fused twin-Q MLP (first layer split into hidden / shortcut pieces,
        # last layer lane-padded to _QL)
        w1h_ref, w1s_ref, b1_ref, w2_ref, b2_ref, w3_ref, b3_ref,
        # output: (1, T*bt, _QL) -> lanes 0/1 are q1/q2
        q_ref,
        # VMEM scratch: per-gate GRU input gates, hidden states, shortcut emb
        gir_scr, giz_scr, gin_scr, hs_scr, sc_scr,
    ):
        f32 = jnp.float32
        relu = jax.nn.relu
        H2, H3 = 2 * H, 3 * H

        a = a_ref[0].astype(cdt)      # (M, Da)
        r = r_ref[0]                  # (M, 1)  (VPU-only path: keep f32)
        o = o_ref[0].astype(cdt)      # (M, Do)
        ca = ca_ref[0].astype(cdt)    # (M, Da)

        # ---- batched (non-recurrent) precompute over all M = T*bt rows -------
        ea = relu(jnp.dot(a, wa_ref[...], preferred_element_type=f32) + ba_ref[...])
        er = relu(r * wr_ref[...] + br_ref[...])     # (M,1)*(1,Er) broadcast, f32 VPU
        eo = relu(jnp.dot(o, wo_ref[...], preferred_element_type=f32) + bo_ref[...])

        # GRU input-side gates for every timestep at once: (M, 3H), split once
        # into three lane-aligned (M, H) buffers so the serial loop never does
        # sub-vreg lane extracts.
        gi = (jnp.dot(ea.astype(cdt), wih_a_ref[...], preferred_element_type=f32)
              + jnp.dot(er.astype(cdt), wih_r_ref[...], preferred_element_type=f32)
              + jnp.dot(eo.astype(cdt), wih_o_ref[...], preferred_element_type=f32)
              + bih_ref[...])
        gir_scr[...] = gi[:, 0:H]
        giz_scr[...] = gi[:, H:H2]
        gin_scr[...] = gi[:, H2:H3]

        # shortcut obs/action embedding (continuous action, no image encoder)
        sc_scr[...] = relu(jnp.dot(o, wsc_o_ref[...], preferred_element_type=f32)
                           + jnp.dot(ca, wsc_a_ref[...], preferred_element_type=f32)
                           + bsc_ref[...])

        # ---- sequential GRU recurrence (kept in f32) --------------------------
        whh_r = whh_r_ref[...]
        whh_z = whh_z_ref[...]
        whh_n = whh_n_ref[...]
        bhh_n = bhh_n_ref[...]

        def step(t, h):
            row = pl.multiple_of(t * bt, bt)
            gh_r = jnp.dot(h, whh_r, preferred_element_type=f32)
            gh_z = jnp.dot(h, whh_z, preferred_element_type=f32)
            gh_n = jnp.dot(h, whh_n, preferred_element_type=f32) + bhh_n
            r_t = jax.nn.sigmoid(gir_scr[pl.ds(row, bt), :] + gh_r)
            z_t = jax.nn.sigmoid(giz_scr[pl.ds(row, bt), :] + gh_z)
            n_t = jnp.tanh(gin_scr[pl.ds(row, bt), :] + r_t * gh_n)
            h_new = (1.0 - z_t) * n_t + z_t * h
            hs_scr[pl.ds(row, bt), :] = h_new
            return h_new

        lax.fori_loop(0, T, step, jnp.zeros((bt, H), f32), unroll=unroll)

        # ---- fused twin Q heads on joint = [hidden | shortcut], batched over M
        hs = hs_scr[...].astype(cdt)
        sc = sc_scr[...].astype(cdt)
        h1 = relu(jnp.dot(hs, w1h_ref[...], preferred_element_type=f32)
                  + jnp.dot(sc, w1s_ref[...], preferred_element_type=f32)
                  + b1_ref[...])
        h2 = relu(jnp.dot(h1.astype(cdt), w2_ref[...], preferred_element_type=f32)
                  + b2_ref[...])
        # lane-dense (M, 128) store; q1/q2 live in lanes 0/1
        q_ref[0] = (jnp.dot(h2.astype(cdt), w3_ref[...], preferred_element_type=f32)
                    + b3_ref[...])

    return kernel


def critic_rnn_forward(params, prev_actions, rewards, observs, current_actions,
                       matmul_dtype=jnp.float32):
    T, B, Da = prev_actions.shape
    Do = observs.shape[-1]
    Ea = params["wa"].shape[1]
    Er = params["wr"].shape[1]
    Eo = params["wo"].shape[1]
    H = params["whh"].shape[-1]
    S = params["wsc"].shape[1]
    D1 = params["q1_w1"].shape[1]
    D2 = params["q1_w2"].shape[1]
    cdt = jnp.dtype(matmul_dtype)

    # -------- glue: fuse / split weights (plain XLA, runs once) ---------------
    wih = params["wih"]                                   # (3, In, H), gate order r,z,n

    def fuse_ih(lo, hi):
        return jnp.transpose(wih[:, lo:hi, :], (1, 0, 2)).reshape(hi - lo, 3 * H)

    wih_a = fuse_ih(0, Ea)
    wih_r = fuse_ih(Ea, Ea + Er)
    wih_o = fuse_ih(Ea + Er, Ea + Er + Eo)
    bih = params["bih"]                                   # (3, H)
    bhh = params["bhh"]                                   # (3, H)
    # fold hidden-side r/z biases into the input-side bias; only b_hn must stay
    # inside the r*(...) term of the GRU n gate.
    bih_fused = jnp.concatenate([bih[0] + bhh[0], bih[1] + bhh[1], bih[2]]
                                ).reshape(1, 3 * H)
    whh_r = params["whh"][0]                              # (H, H) each
    whh_z = params["whh"][1]
    whh_n = params["whh"][2]
    bhh_n = bhh[2].reshape(1, H)

    wsc = params["wsc"]                                   # (Do+Da, S)
    wsc_o, wsc_a = wsc[:Do], wsc[Do:]

    # twin-Q fusion: stack heads along N, block-diagonal middle layer.
    w1 = jnp.concatenate([params["q1_w1"], params["q2_w1"]], axis=1)   # (H+S, 2D1)
    w1h, w1s = w1[:H], w1[H:]
    b1 = jnp.concatenate([params["q1_b1"], params["q2_b1"]]).reshape(1, 2 * D1)
    w2 = jnp.zeros((2 * D1, 2 * D2), jnp.float32)
    w2 = w2.at[:D1, :D2].set(params["q1_w2"]).at[D1:, D2:].set(params["q2_w2"])
    b2 = jnp.concatenate([params["q1_b2"], params["q2_b2"]]).reshape(1, 2 * D2)
    # last layer lane-padded to _QL so the final store is full-width (unmasked)
    w3 = jnp.zeros((2 * D2, _QL), jnp.float32)
    w3 = w3.at[:D2, 0].set(params["q1_w3"][:, 0]).at[D2:, 1].set(params["q2_w3"][:, 0])
    b3 = jnp.zeros((1, _QL), jnp.float32)
    b3 = b3.at[0, 0].set(params["q1_b3"][0]).at[0, 1].set(params["q2_b3"][0])

    def two_d(b):
        return b.reshape(1, -1)

    def c(w):                      # MXU matmul weights in compute dtype
        return w.astype(cdt)

    weight_args = [
        c(params["wa"]), two_d(params["ba"]),
        params["wr"], two_d(params["br"]),        # reward "matmul" is a VPU broadcast
        c(params["wo"]), two_d(params["bo"]),
        c(wih_a), c(wih_r), c(wih_o), bih_fused,
        whh_r, whh_z, whh_n, bhh_n,               # recurrence stays f32
        c(wsc_o), c(wsc_a), two_d(params["bsc"]),
        c(w1h), c(w1s), b1, c(w2), b2, c(w3), b3,
    ]
    weight_bytes = sum(int(w.size) * w.dtype.itemsize for w in weight_args)

    # -------- batch-tile selection --------------------------------------------
    Bp8 = _round_up(B, 8)

    def est_vmem(bt_):
        m = T * bt_
        seq = 2 * m * (Da + 1 + Do + Da) * 4      # double-buffered input tiles
        out = 2 * m * _QL * 4                     # double-buffered output tile
        scr = m * (4 * H + S) * 4                 # gi_r/z/n + hs + sc scratch
        return seq + out + scr + 2 * weight_bytes

    if _is_v7x() and Bp8 >= 16:
        bt = _round_up(-(-Bp8 // 2), 8)           # >=2 tiles so both TCs get work
    else:
        bt = Bp8                                  # single-TC chips: one big tile
    bt = max(8, min(bt, 512))
    while bt > 8 and est_vmem(bt) > _VMEM_BUDGET:
        bt_next = max(8, _round_up(bt // 2, 8))
        if bt_next == bt:
            break
        bt = bt_next
    Bp = _round_up(Bp8, bt)
    nbt = Bp // bt
    M = T * bt

    def prep(x):
        d = x.shape[-1]
        x = x.astype(jnp.float32)
        if Bp != B:
            x = jnp.concatenate([x, jnp.zeros((T, Bp - B, d), jnp.float32)], axis=1)
        # (T, Bp, d) -> (nbt, T*bt, d); rows within a batch tile are time-major.
        return x.reshape(T, nbt, bt, d).transpose(1, 0, 2, 3).reshape(nbt, M, d)

    a2 = prep(prev_actions)
    r2 = prep(rewards)
    o2 = prep(observs)
    ca2 = prep(current_actions)

    def seq_spec(dim):
        return pl.BlockSpec((1, M, dim), lambda i: (i, 0, 0))

    def full_spec(x):
        nd = x.ndim
        return pl.BlockSpec(x.shape, lambda i, _nd=nd: (0,) * _nd)

    in_specs = ([seq_spec(Da), seq_spec(1), seq_spec(Do), seq_spec(Da)]
                + [full_spec(w) for w in weight_args])

    grid_spec = pltpu.PrefetchScalarGridSpec(
        num_scalar_prefetch=0,
        grid=(nbt,),                                  # independent batch tiles
        in_specs=in_specs,
        out_specs=pl.BlockSpec((1, M, _QL), lambda i: (i, 0, 0)),
        scratch_shapes=[pltpu.VMEM((M, H), jnp.float32),   # gi_r
                        pltpu.VMEM((M, H), jnp.float32),   # gi_z
                        pltpu.VMEM((M, H), jnp.float32),   # gi_n
                        pltpu.VMEM((M, H), jnp.float32),   # hidden states
                        pltpu.VMEM((M, S), jnp.float32)],  # shortcut embeds
    )

    cp_kwargs = dict(dimension_semantics=("parallel",))   # batch tiles -> 2 TCs on v7x
    if est_vmem(bt) > _VMEM_DEFAULT_SAFE:
        cp_kwargs["vmem_limit_bytes"] = 30 * 1024 * 1024

    kernel = _build_kernel(T, bt, H, cdt)
    q = pl.pallas_call(
        kernel,
        out_shape=jax.ShapeDtypeStruct((nbt, M, _QL), jnp.float32),
        grid_spec=grid_spec,
        compiler_params=pltpu.CompilerParams(**cp_kwargs),
    )(a2, r2, o2, ca2, *weight_args)

    # (nbt, T*bt, QL) -> (T, Bp, QL); drop batch padding, slice twin-head lanes
    q = q.reshape(nbt, T, bt, _QL).transpose(1, 0, 2, 3).reshape(T, Bp, _QL)
    q1 = q[:, :B, 0:1]
    q2 = q[:, :B, 1:2]
    return q1, q2


# ---------------- pure-JAX reference (mirrors the PyTorch forward) ------------
def ref_forward(params, a, r, o, ca):
    relu = jax.nn.relu
    ea = relu(a @ params["wa"] + params["ba"])
    er = relu(r @ params["wr"] + params["br"])
    eo = relu(o @ params["wo"] + params["bo"])
    x = jnp.concatenate([ea, er, eo], axis=-1)            # (T, B, In)

    wih, whh = params["wih"], params["whh"]
    bih, bhh = params["bih"], params["bhh"]
    B = a.shape[1]
    H = whh.shape[-1]

    def step(h, xt):
        gi = jnp.einsum("bi,gih->gbh", xt, wih) + bih[:, None, :]
        gh = jnp.einsum("bh,ghk->gbk", h, whh) + bhh[:, None, :]
        r_t = jax.nn.sigmoid(gi[0] + gh[0])
        z_t = jax.nn.sigmoid(gi[1] + gh[1])
        n_t = jnp.tanh(gi[2] + r_t * gh[2])
        h_new = (1.0 - z_t) * n_t + z_t * h
        return h_new, h_new

    _, hs = lax.scan(step, jnp.zeros((B, H), jnp.float32), x)

    sc = relu(jnp.concatenate([o, ca], axis=-1) @ params["wsc"] + params["bsc"])
    joint = jnp.concatenate([hs, sc], axis=-1)

    def mlp(p):
        h1 = relu(joint @ params[p + "_w1"] + params[p + "_b1"])
        h2 = relu(h1 @ params[p + "_w2"] + params[p + "_b2"])
        return h2 @ params[p + "_w3"] + params[p + "_b3"]

    return mlp("q1"), mlp("q2")


if __name__ == "__main__":
    # small shapes implied by the module's forward
    T, B = 8, 4            # timesteps, batch
    Do, Da = 16, 4         # obs_dim, action_dim
    Ea, Er, Eo = 8, 8, 16  # action / reward / observ embedding sizes
    H = 32                 # rnn_hidden_size
    In = Ea + Er + Eo      # rnn_input_size
    S = In                 # shortcut_embedding_size
    D1, D2 = 32, 32        # dqn_layers

    key = jax.random.PRNGKey(0)
    ks = jax.random.split(key, 32)

    def w(k, shape, scale=0.1):
        return scale * jax.random.normal(k, shape, jnp.float32)

    params = dict(
        wa=w(ks[0], (Da, Ea)), ba=w(ks[1], (Ea,)),
        wr=w(ks[2], (1, Er)), br=w(ks[3], (Er,)),
        wo=w(ks[4], (Do, Eo)), bo=w(ks[5], (Eo,)),
        # GRU: weights random, biases zero (module inits RNN biases to 0)
        wih=w(ks[6], (3, In, H)), bih=jnp.zeros((3, H), jnp.float32),
        whh=w(ks[7], (3, H, H)), bhh=jnp.zeros((3, H), jnp.float32),
        wsc=w(ks[8], (Do + Da, S)), bsc=w(ks[9], (S,)),
        q1_w1=w(ks[10], (H + S, D1)), q1_b1=w(ks[11], (D1,)),
        q1_w2=w(ks[12], (D1, D2)), q1_b2=w(ks[13], (D2,)),
        q1_w3=w(ks[14], (D2, 1)), q1_b3=w(ks[15], (1,)),
        q2_w1=w(ks[16], (H + S, D1)), q2_b1=w(ks[17], (D1,)),
        q2_w2=w(ks[18], (D1, D2)), q2_b2=w(ks[19], (D2,)),
        q2_w3=w(ks[20], (D2, 1)), q2_b3=w(ks[21], (1,)),
    )

    prev_actions = jax.random.normal(ks[22], (T, B, Da), jnp.float32)
    rewards = jax.random.normal(ks[23], (T, B, 1), jnp.float32)
    observs = jax.random.normal(ks[24], (T, B, Do), jnp.float32)
    current_actions = jax.random.normal(ks[25], (T, B, Da), jnp.float32)

    q1_ref, q2_ref = ref_forward(params, prev_actions, rewards, observs,
                                 current_actions)

    # f32 path (v5e-friendly; also the accuracy baseline)
    fwd = jax.jit(functools.partial(critic_rnn_forward, matmul_dtype=jnp.float32))
    q1, q2 = fwd(params, prev_actions, rewards, observs, current_actions)
    jax.block_until_ready((q1, q2))
    np.testing.assert_allclose(np.asarray(q1), np.asarray(q1_ref),
                               rtol=2e-3, atol=2e-3)
    np.testing.assert_allclose(np.asarray(q2), np.asarray(q2_ref),
                               rtol=2e-3, atol=2e-3)

    # bf16 matmul path (v6e/v7x-friendly); GRU recurrence / gate math stay f32
    fwd_bf16 = jax.jit(functools.partial(critic_rnn_forward,
                                         matmul_dtype=jnp.bfloat16))
    q1b, q2b = fwd_bf16(params, prev_actions, rewards, observs, current_actions)
    jax.block_until_ready((q1b, q2b))
    np.testing.assert_allclose(np.asarray(q1b), np.asarray(q1_ref),
                               rtol=3e-2, atol=3e-2)
    np.testing.assert_allclose(np.asarray(q2b), np.asarray(q2_ref),
                               rtol=3e-2, atol=3e-2)

    print("KERNEL_OK")
</pallas_src>

<mosaic_0001>
module attributes {stable_mosaic.version = 11 : i64} {
  func.func @kernel(%arg0: i32, %arg1: memref<1x64x4xf32, #tpu.memory_space<vmem>>, %arg2: memref<1x64x1xf32, #tpu.memory_space<vmem>>, %arg3: memref<1x64x16xf32, #tpu.memory_space<vmem>>, %arg4: memref<1x64x4xf32, #tpu.memory_space<vmem>>, %arg5: memref<4x8xf32, #tpu.memory_space<vmem>>, %arg6: memref<1x8xf32, #tpu.memory_space<vmem>>, %arg7: memref<1x8xf32, #tpu.memory_space<vmem>>, %arg8: memref<1x8xf32, #tpu.memory_space<vmem>>, %arg9: memref<16x16xf32, #tpu.memory_space<vmem>>, %arg10: memref<1x16xf32, #tpu.memory_space<vmem>>, %arg11: memref<8x96xf32, #tpu.memory_space<vmem>>, %arg12: memref<8x96xf32, #tpu.memory_space<vmem>>, %arg13: memref<16x96xf32, #tpu.memory_space<vmem>>, %arg14: memref<1x96xf32, #tpu.memory_space<vmem>>, %arg15: memref<32x32xf32, #tpu.memory_space<vmem>>, %arg16: memref<32x32xf32, #tpu.memory_space<vmem>>, %arg17: memref<32x32xf32, #tpu.memory_space<vmem>>, %arg18: memref<1x32xf32, #tpu.memory_space<vmem>>, %arg19: memref<16x32xf32, #tpu.memory_space<vmem>>, %arg20: memref<4x32xf32, #tpu.memory_space<vmem>>, %arg21: memref<1x32xf32, #tpu.memory_space<vmem>>, %arg22: memref<32x64xf32, #tpu.memory_space<vmem>>, %arg23: memref<32x64xf32, #tpu.memory_space<vmem>>, %arg24: memref<1x64xf32, #tpu.memory_space<vmem>>, %arg25: memref<64x64xf32, #tpu.memory_space<vmem>>, %arg26: memref<1x64xf32, #tpu.memory_space<vmem>>, %arg27: memref<64x128xf32, #tpu.memory_space<vmem>>, %arg28: memref<1x128xf32, #tpu.memory_space<vmem>>, %arg29: memref<1x64x128xf32, #tpu.memory_space<vmem>>, %arg30: memref<64x32xf32, #tpu.memory_space<vmem>>, %arg31: memref<64x32xf32, #tpu.memory_space<vmem>>, %arg32: memref<64x32xf32, #tpu.memory_space<vmem>>, %arg33: memref<64x32xf32, #tpu.memory_space<vmem>>, %arg34: memref<64x32xf32, #tpu.memory_space<vmem>>) attributes {dimension_semantics = [#tpu.dimension_semantics<parallel>], iteration_bounds = array<i64: 1>, scalar_prefetch = 0 : i64, scratch_operands = 5 : i64, tpu.core_type = #tpu.core_type<tc>, window_params = [{transform_indices = @transform_0, window_bounds = array<i64: 1, 64, 4>}, {transform_indices = @transform_1, window_bounds = array<i64: 1, 64, 1>}, {transform_indices = @transform_2, window_bounds = array<i64: 1, 64, 16>}, {transform_indices = @transform_3, window_bounds = array<i64: 1, 64, 4>}, {pipeline_mode = #tpu.pipeline_mode<synchronous>, transform_indices = @transform_4, window_bounds = array<i64: 4, 8>}, {pipeline_mode = #tpu.pipeline_mode<synchronous>, transform_indices = @transform_5, window_bounds = array<i64: 1, 8>}, {pipeline_mode = #tpu.pipeline_mode<synchronous>, transform_indices = @transform_6, window_bounds = array<i64: 1, 8>}, {pipeline_mode = #tpu.pipeline_mode<synchronous>, transform_indices = @transform_7, window_bounds = array<i64: 1, 8>}, {pipeline_mode = #tpu.pipeline_mode<synchronous>, transform_indices = @transform_8, window_bounds = array<i64: 16, 16>}, {pipeline_mode = #tpu.pipeline_mode<synchronous>, transform_indices = @transform_9, window_bounds = array<i64: 1, 16>}, {pipeline_mode = #tpu.pipeline_mode<synchronous>, transform_indices = @transform_10, window_bounds = array<i64: 8, 96>}, {pipeline_mode = #tpu.pipeline_mode<synchronous>, transform_indices = @transform_11, window_bounds = array<i64: 8, 96>}, {pipeline_mode = #tpu.pipeline_mode<synchronous>, transform_indices = @transform_12, window_bounds = array<i64: 16, 96>}, {pipeline_mode = #tpu.pipeline_mode<synchronous>, transform_indices = @transform_13, window_bounds = array<i64: 1, 96>}, {pipeline_mode = #tpu.pipeline_mode<synchronous>, transform_indices = @transform_14, window_bounds = array<i64: 32, 32>}, {pipeline_mode = #tpu.pipeline_mode<synchronous>, transform_indices = @transform_15, window_bounds = array<i64: 32, 32>}, {pipeline_mode = #tpu.pipeline_mode<synchronous>, transform_indices = @transform_16, window_bounds = array<i64: 32, 32>}, {pipeline_mode = #tpu.pipeline_mode<synchronous>, transform_indices = @transform_17, window_bounds = array<i64: 1, 32>}, {pipeline_mode = #tpu.pipeline_mode<synchronous>, transform_indices = @transform_18, window_bounds = array<i64: 16, 32>}, {pipeline_mode = #tpu.pipeline_mode<synchronous>, transform_indices = @transform_19, window_bounds = array<i64: 4, 32>}, {pipeline_mode = #tpu.pipeline_mode<synchronous>, transform_indices = @transform_20, window_bounds = array<i64: 1, 32>}, {pipeline_mode = #tpu.pipeline_mode<synchronous>, transform_indices = @transform_21, window_bounds = array<i64: 32, 64>}, {pipeline_mode = #tpu.pipeline_mode<synchronous>, transform_indices = @transform_22, window_bounds = array<i64: 32, 64>}, {pipeline_mode = #tpu.pipeline_mode<synchronous>, transform_indices = @transform_23, window_bounds = array<i64: 1, 64>}, {pipeline_mode = #tpu.pipeline_mode<synchronous>, transform_indices = @transform_24, window_bounds = array<i64: 64, 64>}, {pipeline_mode = #tpu.pipeline_mode<synchronous>, transform_indices = @transform_25, window_bounds = array<i64: 1, 64>}, {pipeline_mode = #tpu.pipeline_mode<synchronous>, transform_indices = @transform_26, window_bounds = array<i64: 64, 128>}, {pipeline_mode = #tpu.pipeline_mode<synchronous>, transform_indices = @transform_27, window_bounds = array<i64: 1, 128>}, {transform_indices = @transform_28, window_bounds = array<i64: 1, 64, 128>}]} {
    %c0 = arith.constant 0 : index
    %c0_0 = arith.constant 0 : index
    %c0_1 = arith.constant 0 : index
    %0 = vector.load %arg1[%c0, %c0_0, %c0_1] : memref<1x64x4xf32, #tpu.memory_space<vmem>>, vector<1x64x4xf32>
    %1 = vector.shape_cast %0 : vector<1x64x4xf32> to vector<64x4xf32>
    %c0_2 = arith.constant 0 : index
    %c0_3 = arith.constant 0 : index
    %c0_4 = arith.constant 0 : index
    %2 = vector.load %arg2[%c0_2, %c0_3, %c0_4] : memref<1x64x1xf32, #tpu.memory_space<vmem>>, vector<1x64x1xf32>
    %3 = vector.shape_cast %2 : vector<1x64x1xf32> to vector<64x1xf32>
    %c0_5 = arith.constant 0 : index
    %c0_6 = arith.constant 0 : index
    %c0_7 = arith.constant 0 : index
    %4 = vector.load %arg3[%c0_5, %c0_6, %c0_7] : memref<1x64x16xf32, #tpu.memory_space<vmem>>, vector<1x64x16xf32>
    %5 = vector.shape_cast %4 : vector<1x64x16xf32> to vector<64x16xf32>
    %c0_8 = arith.constant 0 : index
    %c0_9 = arith.constant 0 : index
    %c0_10 = arith.constant 0 : index
    %6 = vector.load %arg4[%c0_8, %c0_9, %c0_10] : memref<1x64x4xf32, #tpu.memory_space<vmem>>, vector<1x64x4xf32>
    %7 = vector.shape_cast %6 : vector<1x64x4xf32> to vector<64x4xf32>
    %c0_11 = arith.constant 0 : index
    %c0_12 = arith.constant 0 : index
    %8 = vector.load %arg5[%c0_11, %c0_12] : memref<4x8xf32, #tpu.memory_space<vmem>>, vector<4x8xf32>
    %cst = arith.constant dense<0.000000e+00> : vector<64x8xf32>
    %9 = tpu.matmul %1, %8, %cst {dimension_numbers = #tpu.dot_dimension_numbers<[1], [0], [0], [1], [0, 0, 1, 1], [], []>} : vector<64x4xf32>, vector<4x8xf32>, vector<64x8xf32> -> vector<64x8xf32>
    %c0_13 = arith.constant 0 : index
    %c0_14 = arith.constant 0 : index
    %10 = vector.load %arg6[%c0_13, %c0_14] : memref<1x8xf32, #tpu.memory_space<vmem>>, vector<1x8xf32>
    %11 = vector.broadcast %10 : vector<1x8xf32> to vector<64x8xf32>
    %12 = arith.addf %9, %11 : vector<64x8xf32>
    %cst_15 = arith.constant 0.000000e+00 : f32
    %13 = vector.broadcast %cst_15 : f32 to vector<64x8xf32>
    %14 = arith.maximumf %12, %13 : vector<64x8xf32>
    %c0_16 = arith.constant 0 : index
    %c0_17 = arith.constant 0 : index
    %15 = vector.load %arg7[%c0_16, %c0_17] : memref<1x8xf32, #tpu.memory_space<vmem>>, vector<1x8xf32>
    %16 = vector.broadcast %3 : vector<64x1xf32> to vector<64x8xf32>
    %17 = vector.broadcast %15 : vector<1x8xf32> to vector<64x8xf32>
    %18 = arith.mulf %16, %17 : vector<64x8xf32>
    %c0_18 = arith.constant 0 : index
    %c0_19 = arith.constant 0 : index
    %19 = vector.load %arg8[%c0_18, %c0_19] : memref<1x8xf32, #tpu.memory_space<vmem>>, vector<1x8xf32>
    %20 = vector.broadcast %19 : vector<1x8xf32> to vector<64x8xf32>
    %21 = arith.addf %18, %20 : vector<64x8xf32>
    %cst_20 = arith.constant 0.000000e+00 : f32
    %22 = vector.broadcast %cst_20 : f32 to vector<64x8xf32>
    %23 = arith.maximumf %21, %22 : vector<64x8xf32>
    %c0_21 = arith.constant 0 : index
    %c0_22 = arith.constant 0 : index
    %24 = vector.load %arg9[%c0_21, %c0_22] : memref<16x16xf32, #tpu.memory_space<vmem>>, vector<16x16xf32>
    %cst_23 = arith.constant dense<0.000000e+00> : vector<64x16xf32>
    %25 = tpu.matmul %5, %24, %cst_23 {dimension_numbers = #tpu.dot_dimension_numbers<[1], [0], [0], [1], [0, 0, 1, 1], [], []>} : vector<64x16xf32>, vector<16x16xf32>, vector<64x16xf32> -> vector<64x16xf32>
    %c0_24 = arith.constant 0 : index
    %c0_25 = arith.constant 0 : index
    %26 = vector.load %arg10[%c0_24, %c0_25] : memref<1x16xf32, #tpu.memory_space<vmem>>, vector<1x16xf32>
    %27 = vector.broadcast %26 : vector<1x16xf32> to vector<64x16xf32>
    %28 = arith.addf %25, %27 : vector<64x16xf32>
    %cst_26 = arith.constant 0.000000e+00 : f32
    %29 = vector.broadcast %cst_26 : f32 to vector<64x16xf32>
    %30 = arith.maximumf %28, %29 : vector<64x16xf32>
    %c0_27 = arith.constant 0 : index
    %c0_28 = arith.constant 0 : index
    %31 = vector.load %arg11[%c0_27, %c0_28] : memref<8x96xf32, #tpu.memory_space<vmem>>, vector<8x96xf32>
    %cst_29 = arith.constant dense<0.000000e+00> : vector<64x96xf32>
    %32 = tpu.matmul %14, %31, %cst_29 {dimension_numbers = #tpu.dot_dimension_numbers<[1], [0], [0], [1], [0, 0, 1, 1], [], []>} : vector<64x8xf32>, vector<8x96xf32>, vector<64x96xf32> -> vector<64x96xf32>
    %c0_30 = arith.constant 0 : index
    %c0_31 = arith.constant 0 : index
    %33 = vector.load %arg12[%c0_30, %c0_31] : memref<8x96xf32, #tpu.memory_space<vmem>>, vector<8x96xf32>
    %cst_32 = arith.constant dense<0.000000e+00> : vector<64x96xf32>
    %34 = tpu.matmul %23, %33, %cst_32 {dimension_numbers = #tpu.dot_dimension_numbers<[1], [0], [0], [1], [0, 0, 1, 1], [], []>} : vector<64x8xf32>, vector<8x96xf32>, vector<64x96xf32> -> vector<64x96xf32>
    %35 = arith.addf %32, %34 : vector<64x96xf32>
    %c0_33 = arith.constant 0 : index
    %c0_34 = arith.constant 0 : index
    %36 = vector.load %arg13[%c0_33, %c0_34] : memref<16x96xf32, #tpu.memory_space<vmem>>, vector<16x96xf32>
    %cst_35 = arith.constant dense<0.000000e+00> : vector<64x96xf32>
    %37 = tpu.matmul %30, %36, %cst_35 {dimension_numbers = #tpu.dot_dimension_numbers<[1], [0], [0], [1], [0, 0, 1, 1], [], []>} : vector<64x16xf32>, vector<16x96xf32>, vector<64x96xf32> -> vector<64x96xf32>
    %38 = arith.addf %35, %37 : vector<64x96xf32>
    %c0_36 = arith.constant 0 : index
    %c0_37 = arith.constant 0 : index
    %39 = vector.load %arg14[%c0_36, %c0_37] : memref<1x96xf32, #tpu.memory_space<vmem>>, vector<1x96xf32>
    %40 = vector.broadcast %39 : vector<1x96xf32> to vector<64x96xf32>
    %41 = arith.addf %38, %40 : vector<64x96xf32>
    %42 = vector.extract_strided_slice %41 {offsets = [0, 0], sizes = [64, 32], strides = [1, 1]} : vector<64x96xf32> to vector<64x32xf32>
    %c0_38 = arith.constant 0 : index
    %c0_39 = arith.constant 0 : index
    %43 = vector.load %arg30[%c0_38, %c0_39] : memref<64x32xf32, #tpu.memory_space<vmem>>, vector<64x32xf32>
    tpu.vector_store %arg30[%c0_38, %c0_39], %42 {strides = array<i32>} : memref<64x32xf32, #tpu.memory_space<vmem>>, vector<64x32xf32>,
    %44 = vector.extract_strided_slice %41 {offsets = [0, 32], sizes = [64, 32], strides = [1, 1]} : vector<64x96xf32> to vector<64x32xf32>
    %c0_40 = arith.constant 0 : index
    %c0_41 = arith.constant 0 : index
    %45 = vector.load %arg31[%c0_40, %c0_41] : memref<64x32xf32, #tpu.memory_space<vmem>>, vector<64x32xf32>
    tpu.vector_store %arg31[%c0_40, %c0_41], %44 {strides = array<i32>} : memref<64x32xf32, #tpu.memory_space<vmem>>, vector<64x32xf32>,
    %46 = vector.extract_strided_slice %41 {offsets = [0, 64], sizes = [64, 32], strides = [1, 1]} : vector<64x96xf32> to vector<64x32xf32>
    %c0_42 = arith.constant 0 : index
    %c0_43 = arith.constant 0 : index
    %47 = vector.load %arg32[%c0_42, %c0_43] : memref<64x32xf32, #tpu.memory_space<vmem>>, vector<64x32xf32>
    tpu.vector_store %arg32[%c0_42, %c0_43], %46 {strides = array<i32>} : memref<64x32xf32, #tpu.memory_space<vmem>>, vector<64x32xf32>,
    %c0_44 = arith.constant 0 : index
    %c0_45 = arith.constant 0 : index
    %48 = vector.load %arg19[%c0_44, %c0_45] : memref<16x32xf32, #tpu.memory_space<vmem>>, vector<16x32xf32>
    %cst_46 = arith.constant dense<0.000000e+00> : vector<64x32xf32>
    %49 = tpu.matmul %5, %48, %cst_46 {dimension_numbers = #tpu.dot_dimension_numbers<[1], [0], [0], [1], [0, 0, 1, 1], [], []>} : vector<64x16xf32>, vector<16x32xf32>, vector<64x32xf32> -> vector<64x32xf32>
    %c0_47 = arith.constant 0 : index
    %c0_48 = arith.constant 0 : index
    %50 = vector.load %arg20[%c0_47, %c0_48] : memref<4x32xf32, #tpu.memory_space<vmem>>, vector<4x32xf32>
    %cst_49 = arith.constant dense<0.000000e+00> : vector<64x32xf32>
    %51 = tpu.matmul %7, %50, %cst_49 {dimension_numbers = #tpu.dot_dimension_numbers<[1], [0], [0], [1], [0, 0, 1, 1], [], []>} : vector<64x4xf32>, vector<4x32xf32>, vector<64x32xf32> -> vector<64x32xf32>
    %52 = arith.addf %49, %51 : vector<64x32xf32>
    %c0_50 = arith.constant 0 : index
    %c0_51 = arith.constant 0 : index
    %53 = vector.load %arg21[%c0_50, %c0_51] : memref<1x32xf32, #tpu.memory_space<vmem>>, vector<1x32xf32>
    %54 = vector.broadcast %53 : vector<1x32xf32> to vector<64x32xf32>
    %55 = arith.addf %52, %54 : vector<64x32xf32>
    %cst_52 = arith.constant 0.000000e+00 : f32
    %56 = vector.broadcast %cst_52 : f32 to vector<64x32xf32>
    %57 = arith.maximumf %55, %56 : vector<64x32xf32>
    %c0_53 = arith.constant 0 : index
    %c0_54 = arith.constant 0 : index
    %58 = vector.load %arg34[%c0_53, %c0_54] : memref<64x32xf32, #tpu.memory_space<vmem>>, vector<64x32xf32>
    tpu.vector_store %arg34[%c0_53, %c0_54], %57 {strides = array<i32>} : memref<64x32xf32, #tpu.memory_space<vmem>>, vector<64x32xf32>,
    %c0_55 = arith.constant 0 : index
    %c0_56 = arith.constant 0 : index
    %59 = vector.load %arg15[%c0_55, %c0_56] : memref<32x32xf32, #tpu.memory_space<vmem>>, vector<32x32xf32>
    %c0_57 = arith.constant 0 : index
    %c0_58 = arith.constant 0 : index
    %60 = vector.load %arg16[%c0_57, %c0_58] : memref<32x32xf32, #tpu.memory_space<vmem>>, vector<32x32xf32>
    %c0_59 = arith.constant 0 : index
    %c0_60 = arith.constant 0 : index
    %61 = vector.load %arg17[%c0_59, %c0_60] : memref<32x32xf32, #tpu.memory_space<vmem>>, vector<32x32xf32>
    %c0_61 = arith.constant 0 : index
    %c0_62 = arith.constant 0 : index
    %62 = vector.load %arg18[%c0_61, %c0_62] : memref<1x32xf32, #tpu.memory_space<vmem>>, vector<1x32xf32>
    %cst_63 = arith.constant 0.000000e+00 : f32
    %63 = vector.broadcast %cst_63 : f32 to vector<8x32xf32>
    %c0_i32 = arith.constant 0 : i32
    %c8_i32 = arith.constant 8 : i32
    %64 = arith.muli %c0_i32, %c8_i32 : i32
    %65 = tpu.assume_multiple %64, 8 : i32
    %cst_64 = arith.constant dense<0.000000e+00> : vector<8x32xf32>
    %66 = tpu.matmul %63, %59, %cst_64 {dimension_numbers = #tpu.dot_dimension_numbers<[1], [0], [0], [1], [0, 0, 1, 1], [], []>} : vector<8x32xf32>, vector<32x32xf32>, vector<8x32xf32> -> vector<8x32xf32>
    %cst_65 = arith.constant dense<0.000000e+00> : vector<8x32xf32>
    %67 = tpu.matmul %63, %60, %cst_65 {dimension_numbers = #tpu.dot_dimension_numbers<[1], [0], [0], [1], [0, 0, 1, 1], [], []>} : vector<8x32xf32>, vector<32x32xf32>, vector<8x32xf32> -> vector<8x32xf32>
    %cst_66 = arith.constant dense<0.000000e+00> : vector<8x32xf32>
    %68 = tpu.matmul %63, %61, %cst_66 {dimension_numbers = #tpu.dot_dimension_numbers<[1], [0], [0], [1], [0, 0, 1, 1], [], []>} : vector<8x32xf32>, vector<32x32xf32>, vector<8x32xf32> -> vector<8x32xf32>
    %69 = vector.broadcast %62 : vector<1x32xf32> to vector<8x32xf32>
    %70 = arith.addf %68, %69 : vector<8x32xf32>
    %71 = arith.index_cast %65 : i32 to index
    %c0_67 = arith.constant 0 : index
    %72 = vector.load %arg30[%71, %c0_67] : memref<64x32xf32, #tpu.memory_space<vmem>>, vector<8x32xf32>
    %73 = arith.addf %72, %66 : vector<8x32xf32>
    %74 = arith.negf %73 : vector<8x32xf32>
    %75 = math.exp %74 : vector<8x32xf32>
    %cst_68 = arith.constant 1.000000e+00 : f32
    %76 = vector.broadcast %cst_68 : f32 to vector<8x32xf32>
    %77 = arith.addf %76, %75 : vector<8x32xf32>
    %78 = arith.divf %76, %77 : vector<8x32xf32>
    %79 = arith.index_cast %65 : i32 to index
    %c0_69 = arith.constant 0 : index
    %80 = vector.load %arg31[%79, %c0_69] : memref<64x32xf32, #tpu.memory_space<vmem>>, vector<8x32xf32>
    %81 = arith.addf %80, %67 : vector<8x32xf32>
    %82 = arith.negf %81 : vector<8x32xf32>
    %83 = math.exp %82 : vector<8x32xf32>
    %cst_70 = arith.constant 1.000000e+00 : f32
    %84 = vector.broadcast %cst_70 : f32 to vector<8x32xf32>
    %85 = arith.addf %84, %83 : vector<8x32xf32>
    %86 = arith.divf %84, %85 : vector<8x32xf32>
    %87 = arith.index_cast %65 : i32 to index
    %c0_71 = arith.constant 0 : index
    %88 = vector.load %arg32[%87, %c0_71] : memref<64x32xf32, #tpu.memory_space<vmem>>, vector<8x32xf32>
    %89 = arith.mulf %78, %70 : vector<8x32xf32>
    %90 = arith.addf %88, %89 : vector<8x32xf32>
    %91 = math.tanh %90 : vector<8x32xf32>
    %cst_72 = arith.constant 1.000000e+00 : f32
    %92 = vector.broadcast %cst_72 : f32 to vector<8x32xf32>
    %93 = arith.subf %92, %86 : vector<8x32xf32>
    %94 = arith.mulf %93, %91 : vector<8x32xf32>
    %95 = arith.mulf %86, %63 : vector<8x32xf32>
    %96 = arith.addf %94, %95 : vector<8x32xf32>
    %97 = arith.index_cast %65 : i32 to index
    %c0_73 = arith.constant 0 : index
    %98 = vector.load %arg33[%97, %c0_73] : memref<64x32xf32, #tpu.memory_space<vmem>>, vector<8x32xf32>
    tpu.vector_store %arg33[%97, %c0_73], %96 {strides = array<i32>} : memref<64x32xf32, #tpu.memory_space<vmem>>, vector<8x32xf32>,
    %c1_i32 = arith.constant 1 : i32
    %c8_i32_74 = arith.constant 8 : i32
    %99 = arith.muli %c1_i32, %c8_i32_74 : i32
    %100 = tpu.assume_multiple %99, 8 : i32
    %cst_75 = arith.constant dense<0.000000e+00> : vector<8x32xf32>
    %101 = tpu.matmul %96, %59, %cst_75 {dimension_numbers = #tpu.dot_dimension_numbers<[1], [0], [0], [1], [0, 0, 1, 1], [], []>} : vector<8x32xf32>, vector<32x32xf32>, vector<8x32xf32> -> vector<8x32xf32>
    %cst_76 = arith.constant dense<0.000000e+00> : vector<8x32xf32>
    %102 = tpu.matmul %96, %60, %cst_76 {dimension_numbers = #tpu.dot_dimension_numbers<[1], [0], [0], [1], [0, 0, 1, 1], [], []>} : vector<8x32xf32>, vector<32x32xf32>, vector<8x32xf32> -> vector<8x32xf32>
    %cst_77 = arith.constant dense<0.000000e+00> : vector<8x32xf32>
    %103 = tpu.matmul %96, %61, %cst_77 {dimension_numbers = #tpu.dot_dimension_numbers<[1], [0], [0], [1], [0, 0, 1, 1], [], []>} : vector<8x32xf32>, vector<32x32xf32>, vector<8x32xf32> -> vector<8x32xf32>
    %104 = vector.broadcast %62 : vector<1x32xf32> to vector<8x32xf32>
    %105 = arith.addf %103, %104 : vector<8x32xf32>
    %106 = arith.index_cast %100 : i32 to index
    %c0_78 = arith.constant 0 : index
    %107 = vector.load %arg30[%106, %c0_78] : memref<64x32xf32, #tpu.memory_space<vmem>>, vector<8x32xf32>
    %108 = arith.addf %107, %101 : vector<8x32xf32>
    %109 = arith.negf %108 : vector<8x32xf32>
    %110 = math.exp %109 : vector<8x32xf32>
    %cst_79 = arith.constant 1.000000e+00 : f32
    %111 = vector.broadcast %cst_79 : f32 to vector<8x32xf32>
    %112 = arith.addf %111, %110 : vector<8x32xf32>
    %113 = arith.divf %111, %112 : vector<8x32xf32>
    %114 = arith.index_cast %100 : i32 to index
    %c0_80 = arith.constant 0 : index
    %115 = vector.load %arg31[%114, %c0_80] : memref<64x32xf32, #tpu.memory_space<vmem>>, vector<8x32xf32>
    %116 = arith.addf %115, %102 : vector<8x32xf32>
    %117 = arith.negf %116 : vector<8x32xf32>
    %118 = math.exp %117 : vector<8x32xf32>
    %cst_81 = arith.constant 1.000000e+00 : f32
    %119 = vector.broadcast %cst_81 : f32 to vector<8x32xf32>
    %120 = arith.addf %119, %118 : vector<8x32xf32>
    %121 = arith.divf %119, %120 : vector<8x32xf32>
    %122 = arith.index_cast %100 : i32 to index
    %c0_82 = arith.constant 0 : index
    %123 = vector.load %arg32[%122, %c0_82] : memref<64x32xf32, #tpu.memory_space<vmem>>, vector<8x32xf32>
    %124 = arith.mulf %113, %105 : vector<8x32xf32>
    %125 = arith.addf %123, %124 : vector<8x32xf32>
    %126 = math.tanh %125 : vector<8x32xf32>
    %cst_83 = arith.constant 1.000000e+00 : f32
    %127 = vector.broadcast %cst_83 : f32 to vector<8x32xf32>
    %128 = arith.subf %127, %121 : vector<8x32xf32>
    %129 = arith.mulf %128, %126 : vector<8x32xf32>
    %130 = arith.mulf %121, %96 : vector<8x32xf32>
    %131 = arith.addf %129, %130 : vector<8x32xf32>
    %132 = arith.index_cast %100 : i32 to index
    %c0_84 = arith.constant 0 : index
    %133 = vector.load %arg33[%132, %c0_84] : memref<64x32xf32, #tpu.memory_space<vmem>>, vector<8x32xf32>
    tpu.vector_store %arg33[%132, %c0_84], %131 {strides = array<i32>} : memref<64x32xf32, #tpu.memory_space<vmem>>, vector<8x32xf32>,
    %c2_i32 = arith.constant 2 : i32
    %c8_i32_85 = arith.constant 8 : i32
    %134 = arith.muli %c2_i32, %c8_i32_85 : i32
    %135 = tpu.assume_multiple %134, 8 : i32
    %cst_86 = arith.constant dense<0.000000e+00> : vector<8x32xf32>
    %136 = tpu.matmul %131, %59, %cst_86 {dimension_numbers = #tpu.dot_dimension_numbers<[1], [0], [0], [1], [0, 0, 1, 1], [], []>} : vector<8x32xf32>, vector<32x32xf32>, vector<8x32xf32> -> vector<8x32xf32>
    %cst_87 = arith.constant dense<0.000000e+00> : vector<8x32xf32>
    %137 = tpu.matmul %131, %60, %cst_87 {dimension_numbers = #tpu.dot_dimension_numbers<[1], [0], [0], [1], [0, 0, 1, 1], [], []>} : vector<8x32xf32>, vector<32x32xf32>, vector<8x32xf32> -> vector<8x32xf32>
    %cst_88 = arith.constant dense<0.000000e+00> : vector<8x32xf32>
    %138 = tpu.matmul %131, %61, %cst_88 {dimension_numbers = #tpu.dot_dimension_numbers<[1], [0], [0], [1], [0, 0, 1, 1], [], []>} : vector<8x32xf32>, vector<32x32xf32>, vector<8x32xf32> -> vector<8x32xf32>
    %139 = vector.broadcast %62 : vector<1x32xf32> to vector<8x32xf32>
    %140 = arith.addf %138, %139 : vector<8x32xf32>
    %141 = arith.index_cast %135 : i32 to index
    %c0_89 = arith.constant 0 : index
    %142 = vector.load %arg30[%141, %c0_89] : memref<64x32xf32, #tpu.memory_space<vmem>>, vector<8x32xf32>
    %143 = arith.addf %142, %136 : vector<8x32xf32>
    %144 = arith.negf %143 : vector<8x32xf32>
    %145 = math.exp %144 : vector<8x32xf32>
    %cst_90 = arith.constant 1.000000e+00 : f32
    %146 = vector.broadcast %cst_90 : f32 to vector<8x32xf32>
    %147 = arith.addf %146, %145 : vector<8x32xf32>
    %148 = arith.divf %146, %147 : vector<8x32xf32>
    %149 = arith.index_cast %135 : i32 to index
    %c0_91 = arith.constant 0 : index
    %150 = vector.load %arg31[%149, %c0_91] : memref<64x32xf32, #tpu.memory_space<vmem>>, vector<8x32xf32>
    %151 = arith.addf %150, %137 : vector<8x32xf32>
    %152 = arith.negf %151 : vector<8x32xf32>
    %153 = math.exp %152 : vector<8x32xf32>
    %cst_92 = arith.constant 1.000000e+00 : f32
    %154 = vector.broadcast %cst_92 : f32 to vector<8x32xf32>
    %155 = arith.addf %154, %153 : vector<8x32xf32>
    %156 = arith.divf %154, %155 : vector<8x32xf32>
    %157 = arith.index_cast %135 : i32 to index
    %c0_93 = arith.constant 0 : index
    %158 = vector.load %arg32[%157, %c0_93] : memref<64x32xf32, #tpu.memory_space<vmem>>, vector<8x32xf32>
    %159 = arith.mulf %148, %140 : vector<8x32xf32>
    %160 = arith.addf %158, %159 : vector<8x32xf32>
    %161 = math.tanh %160 : vector<8x32xf32>
    %cst_94 = arith.constant 1.000000e+00 : f32
    %162 = vector.broadcast %cst_94 : f32 to vector<8x32xf32>
    %163 = arith.subf %162, %156 : vector<8x32xf32>
    %164 = arith.mulf %163, %161 : vector<8x32xf32>
    %165 = arith.mulf %156, %131 : vector<8x32xf32>
    %166 = arith.addf %164, %165 : vector<8x32xf32>
    %167 = arith.index_cast %135 : i32 to index
    %c0_95 = arith.constant 0 : index
    %168 = vector.load %arg33[%167, %c0_95] : memref<64x32xf32, #tpu.memory_space<vmem>>, vector<8x32xf32>
    tpu.vector_store %arg33[%167, %c0_95], %166 {strides = array<i32>} : memref<64x32xf32, #tpu.memory_space<vmem>>, vector<8x32xf32>,
    %c3_i32 = arith.constant 3 : i32
    %c8_i32_96 = arith.constant 8 : i32
    %169 = arith.muli %c3_i32, %c8_i32_96 : i32
    %170 = tpu.assume_multiple %169, 8 : i32
    %cst_97 = arith.constant dense<0.000000e+00> : vector<8x32xf32>
    %171 = tpu.matmul %166, %59, %cst_97 {dimension_numbers = #tpu.dot_dimension_numbers<[1], [0], [0], [1], [0, 0, 1, 1], [], []>} : vector<8x32xf32>, vector<32x32xf32>, vector<8x32xf32> -> vector<8x32xf32>
    %cst_98 = arith.constant dense<0.000000e+00> : vector<8x32xf32>
    %172 = tpu.matmul %166, %60, %cst_98 {dimension_numbers = #tpu.dot_dimension_numbers<[1], [0], [0], [1], [0, 0, 1, 1], [], []>} : vector<8x32xf32>, vector<32x32xf32>, vector<8x32xf32> -> vector<8x32xf32>
    %cst_99 = arith.constant dense<0.000000e+00> : vector<8x32xf32>
    %173 = tpu.matmul %166, %61, %cst_99 {dimension_numbers = #tpu.dot_dimension_numbers<[1], [0], [0], [1], [0, 0, 1, 1], [], []>} : vector<8x32xf32>, vector<32x32xf32>, vector<8x32xf32> -> vector<8x32xf32>
    %174 = vector.broadcast %62 : vector<1x32xf32> to vector<8x32xf32>
    %175 = arith.addf %173, %174 : vector<8x32xf32>
    %176 = arith.index_cast %170 : i32 to index
    %c0_100 = arith.constant 0 : index
    %177 = vector.load %arg30[%176, %c0_100] : memref<64x32xf32, #tpu.memory_space<vmem>>, vector<8x32xf32>
    %178 = arith.addf %177, %171 : vector<8x32xf32>
    %179 = arith.negf %178 : vector<8x32xf32>
    %180 = math.exp %179 : vector<8x32xf32>
    %cst_101 = arith.constant 1.000000e+00 : f32
    %181 = vector.broadcast %cst_101 : f32 to vector<8x32xf32>
    %182 = arith.addf %181, %180 : vector<8x32xf32>
    %183 = arith.divf %181, %182 : vector<8x32xf32>
    %184 = arith.index_cast %170 : i32 to index
    %c0_102 = arith.constant 0 : index
    %185 = vector.load %arg31[%184, %c0_102] : memref<64x32xf32, #tpu.memory_space<vmem>>, vector<8x32xf32>
    %186 = arith.addf %185, %172 : vector<8x32xf32>
    %187 = arith.negf %186 : vector<8x32xf32>
    %188 = math.exp %187 : vector<8x32xf32>
    %cst_103 = arith.constant 1.000000e+00 : f32
    %189 = vector.broadcast %cst_103 : f32 to vector<8x32xf32>
    %190 = arith.addf %189, %188 : vector<8x32xf32>
    %191 = arith.divf %189, %190 : vector<8x32xf32>
    %192 = arith.index_cast %170 : i32 to index
    %c0_104 = arith.constant 0 : index
    %193 = vector.load %arg32[%192, %c0_104] : memref<64x32xf32, #tpu.memory_space<vmem>>, vector<8x32xf32>
    %194 = arith.mulf %183, %175 : vector<8x32xf32>
    %195 = arith.addf %193, %194 : vector<8x32xf32>
    %196 = math.tanh %195 : vector<8x32xf32>
    %cst_105 = arith.constant 1.000000e+00 : f32
    %197 = vector.broadcast %cst_105 : f32 to vector<8x32xf32>
    %198 = arith.subf %197, %191 : vector<8x32xf32>
    %199 = arith.mulf %198, %196 : vector<8x32xf32>
    %200 = arith.mulf %191, %166 : vector<8x32xf32>
    %201 = arith.addf %199, %200 : vector<8x32xf32>
    %202 = arith.index_cast %170 : i32 to index
    %c0_106 = arith.constant 0 : index
    %203 = vector.load %arg33[%202, %c0_106] : memref<64x32xf32, #tpu.memory_space<vmem>>, vector<8x32xf32>
    tpu.vector_store %arg33[%202, %c0_106], %201 {strides = array<i32>} : memref<64x32xf32, #tpu.memory_space<vmem>>, vector<8x32xf32>,
    %c4_i32 = arith.constant 4 : i32
    %c8_i32_107 = arith.constant 8 : i32
    %204 = arith.muli %c4_i32, %c8_i32_107 : i32
    %205 = tpu.assume_multiple %204, 8 : i32
    %cst_108 = arith.constant dense<0.000000e+00> : vector<8x32xf32>
    %206 = tpu.matmul %201, %59, %cst_108 {dimension_numbers = #tpu.dot_dimension_numbers<[1], [0], [0], [1], [0, 0, 1, 1], [], []>} : vector<8x32xf32>, vector<32x32xf32>, vector<8x32xf32> -> vector<8x32xf32>
    %cst_109 = arith.constant dense<0.000000e+00> : vector<8x32xf32>
    %207 = tpu.matmul %201, %60, %cst_109 {dimension_numbers = #tpu.dot_dimension_numbers<[1], [0], [0], [1], [0, 0, 1, 1], [], []>} : vector<8x32xf32>, vector<32x32xf32>, vector<8x32xf32> -> vector<8x32xf32>
    %cst_110 = arith.constant dense<0.000000e+00> : vector<8x32xf32>
    %208 = tpu.matmul %201, %61, %cst_110 {dimension_numbers = #tpu.dot_dimension_numbers<[1], [0], [0], [1], [0, 0, 1, 1], [], []>} : vector<8x32xf32>, vector<32x32xf32>, vector<8x32xf32> -> vector<8x32xf32>
    %209 = vector.broadcast %62 : vector<1x32xf32> to vector<8x32xf32>
    %210 = arith.addf %208, %209 : vector<8x32xf32>
    %211 = arith.index_cast %205 : i32 to index
    %c0_111 = arith.constant 0 : index
    %212 = vector.load %arg30[%211, %c0_111] : memref<64x32xf32, #tpu.memory_space<vmem>>, vector<8x32xf32>
    %213 = arith.addf %212, %206 : vector<8x32xf32>
    %214 = arith.negf %213 : vector<8x32xf32>
    %215 = math.exp %214 : vector<8x32xf32>
    %cst_112 = arith.constant 1.000000e+00 : f32
    %216 = vector.broadcast %cst_112 : f32 to vector<8x32xf32>
    %217 = arith.addf %216, %215 : vector<8x32xf32>
    %218 = arith.divf %216, %217 : vector<8x32xf32>
    %219 = arith.index_cast %205 : i32 to index
    %c0_113 = arith.constant 0 : index
    %220 = vector.load %arg31[%219, %c0_113] : memref<64x32xf32, #tpu.memory_space<vmem>>, vector<8x32xf32>
    %221 = arith.addf %220, %207 : vector<8x32xf32>
    %222 = arith.negf %221 : vector<8x32xf32>
    %223 = math.exp %222 : vector<8x32xf32>
    %cst_114 = arith.constant 1.000000e+00 : f32
    %224 = vector.broadcast %cst_114 : f32 to vector<8x32xf32>
    %225 = arith.addf %224, %223 : vector<8x32xf32>
    %226 = arith.divf %224, %225 : vector<8x32xf32>
    %227 = arith.index_cast %205 : i32 to index
    %c0_115 = arith.constant 0 : index
    %228 = vector.load %arg32[%227, %c0_115] : memref<64x32xf32, #tpu.memory_space<vmem>>, vector<8x32xf32>
    %229 = arith.mulf %218, %210 : vector<8x32xf32>
    %230 = arith.addf %228, %229 : vector<8x32xf32>
    %231 = math.tanh %230 : vector<8x32xf32>
    %cst_116 = arith.constant 1.000000e+00 : f32
    %232 = vector.broadcast %cst_116 : f32 to vector<8x32xf32>
    %233 = arith.subf %232, %226 : vector<8x32xf32>
    %234 = arith.mulf %233, %231 : vector<8x32xf32>
    %235 = arith.mulf %226, %201 : vector<8x32xf32>
    %236 = arith.addf %234, %235 : vector<8x32xf32>
    %237 = arith.index_cast %205 : i32 to index
    %c0_117 = arith.constant 0 : index
    %238 = vector.load %arg33[%237, %c0_117] : memref<64x32xf32, #tpu.memory_space<vmem>>, vector<8x32xf32>
    tpu.vector_store %arg33[%237, %c0_117], %236 {strides = array<i32>} : memref<64x32xf32, #tpu.memory_space<vmem>>, vector<8x32xf32>,
    %c5_i32 = arith.constant 5 : i32
    %c8_i32_118 = arith.constant 8 : i32
    %239 = arith.muli %c5_i32, %c8_i32_118 : i32
    %240 = tpu.assume_multiple %239, 8 : i32
    %cst_119 = arith.constant dense<0.000000e+00> : vector<8x32xf32>
    %241 = tpu.matmul %236, %59, %cst_119 {dimension_numbers = #tpu.dot_dimension_numbers<[1], [0], [0], [1], [0, 0, 1, 1], [], []>} : vector<8x32xf32>, vector<32x32xf32>, vector<8x32xf32> -> vector<8x32xf32>
    %cst_120 = arith.constant dense<0.000000e+00> : vector<8x32xf32>
    %242 = tpu.matmul %236, %60, %cst_120 {dimension_numbers = #tpu.dot_dimension_numbers<[1], [0], [0], [1], [0, 0, 1, 1], [], []>} : vector<8x32xf32>, vector<32x32xf32>, vector<8x32xf32> -> vector<8x32xf32>
    %cst_121 = arith.constant dense<0.000000e+00> : vector<8x32xf32>
    %243 = tpu.matmul %236, %61, %cst_121 {dimension_numbers = #tpu.dot_dimension_numbers<[1], [0], [0], [1], [0, 0, 1, 1], [], []>} : vector<8x32xf32>, vector<32x32xf32>, vector<8x32xf32> -> vector<8x32xf32>
    %244 = vector.broadcast %62 : vector<1x32xf32> to vector<8x32xf32>
    %245 = arith.addf %243, %244 : vector<8x32xf32>
    %246 = arith.index_cast %240 : i32 to index
    %c0_122 = arith.constant 0 : index
    %247 = vector.load %arg30[%246, %c0_122] : memref<64x32xf32, #tpu.memory_space<vmem>>, vector<8x32xf32>
    %248 = arith.addf %247, %241 : vector<8x32xf32>
    %249 = arith.negf %248 : vector<8x32xf32>
    %250 = math.exp %249 : vector<8x32xf32>
    %cst_123 = arith.constant 1.000000e+00 : f32
    %251 = vector.broadcast %cst_123 : f32 to vector<8x32xf32>
    %252 = arith.addf %251, %250 : vector<8x32xf32>
    %253 = arith.divf %251, %252 : vector<8x32xf32>
    %254 = arith.index_cast %240 : i32 to index
    %c0_124 = arith.constant 0 : index
    %255 = vector.load %arg31[%254, %c0_124] : memref<64x32xf32, #tpu.memory_space<vmem>>, vector<8x32xf32>
    %256 = arith.addf %255, %242 : vector<8x32xf32>
    %257 = arith.negf %256 : vector<8x32xf32>
    %258 = math.exp %257 : vector<8x32xf32>
    %cst_125 = arith.constant 1.000000e+00 : f32
    %259 = vector.broadcast %cst_125 : f32 to vector<8x32xf32>
    %260 = arith.addf %259, %258 : vector<8x32xf32>
    %261 = arith.divf %259, %260 : vector<8x32xf32>
    %262 = arith.index_cast %240 : i32 to index
    %c0_126 = arith.constant 0 : index
    %263 = vector.load %arg32[%262, %c0_126] : memref<64x32xf32, #tpu.memory_space<vmem>>, vector<8x32xf32>
    %264 = arith.mulf %253, %245 : vector<8x32xf32>
    %265 = arith.addf %263, %264 : vector<8x32xf32>
    %266 = math.tanh %265 : vector<8x32xf32>
    %cst_127 = arith.constant 1.000000e+00 : f32
    %267 = vector.broadcast %cst_127 : f32 to vector<8x32xf32>
    %268 = arith.subf %267, %261 : vector<8x32xf32>
    %269 = arith.mulf %268, %266 : vector<8x32xf32>
    %270 = arith.mulf %261, %236 : vector<8x32xf32>
    %271 = arith.addf %269, %270 : vector<8x32xf32>
    %272 = arith.index_cast %240 : i32 to index
    %c0_128 = arith.constant 0 : index
    %273 = vector.load %arg33[%272, %c0_128] : memref<64x32xf32, #tpu.memory_space<vmem>>, vector<8x32xf32>
    tpu.vector_store %arg33[%272, %c0_128], %271 {strides = array<i32>} : memref<64x32xf32, #tpu.memory_space<vmem>>, vector<8x32xf32>,
    %c6_i32 = arith.constant 6 : i32
    %c8_i32_129 = arith.constant 8 : i32
    %274 = arith.muli %c6_i32, %c8_i32_129 : i32
    %275 = tpu.assume_multiple %274, 8 : i32
    %cst_130 = arith.constant dense<0.000000e+00> : vector<8x32xf32>
    %276 = tpu.matmul %271, %59, %cst_130 {dimension_numbers = #tpu.dot_dimension_numbers<[1], [0], [0], [1], [0, 0, 1, 1], [], []>} : vector<8x32xf32>, vector<32x32xf32>, vector<8x32xf32> -> vector<8x32xf32>
    %cst_131 = arith.constant dense<0.000000e+00> : vector<8x32xf32>
    %277 = tpu.matmul %271, %60, %cst_131 {dimension_numbers = #tpu.dot_dimension_numbers<[1], [0], [0], [1], [0, 0, 1, 1], [], []>} : vector<8x32xf32>, vector<32x32xf32>, vector<8x32xf32> -> vector<8x32xf32>
    %cst_132 = arith.constant dense<0.000000e+00> : vector<8x32xf32>
    %278 = tpu.matmul %271, %61, %cst_132 {dimension_numbers = #tpu.dot_dimension_numbers<[1], [0], [0], [1], [0, 0, 1, 1], [], []>} : vector<8x32xf32>, vector<32x32xf32>, vector<8x32xf32> -> vector<8x32xf32>
    %279 = vector.broadcast %62 : vector<1x32xf32> to vector<8x32xf32>
    %280 = arith.addf %278, %279 : vector<8x32xf32>
    %281 = arith.index_cast %275 : i32 to index
    %c0_133 = arith.constant 0 : index
    %282 = vector.load %arg30[%281, %c0_133] : memref<64x32xf32, #tpu.memory_space<vmem>>, vector<8x32xf32>
    %283 = arith.addf %282, %276 : vector<8x32xf32>
    %284 = arith.negf %283 : vector<8x32xf32>
    %285 = math.exp %284 : vector<8x32xf32>
    %cst_134 = arith.constant 1.000000e+00 : f32
    %286 = vector.broadcast %cst_134 : f32 to vector<8x32xf32>
    %287 = arith.addf %286, %285 : vector<8x32xf32>
    %288 = arith.divf %286, %287 : vector<8x32xf32>
    %289 = arith.index_cast %275 : i32 to index
    %c0_135 = arith.constant 0 : index
    %290 = vector.load %arg31[%289, %c0_135] : memref<64x32xf32, #tpu.memory_space<vmem>>, vector<8x32xf32>
    %291 = arith.addf %290, %277 : vector<8x32xf32>
    %292 = arith.negf %291 : vector<8x32xf32>
    %293 = math.exp %292 : vector<8x32xf32>
    %cst_136 = arith.constant 1.000000e+00 : f32
    %294 = vector.broadcast %cst_136 : f32 to vector<8x32xf32>
    %295 = arith.addf %294, %293 : vector<8x32xf32>
    %296 = arith.divf %294, %295 : vector<8x32xf32>
    %297 = arith.index_cast %275 : i32 to index
    %c0_137 = arith.constant 0 : index
    %298 = vector.load %arg32[%297, %c0_137] : memref<64x32xf32, #tpu.memory_space<vmem>>, vector<8x32xf32>
    %299 = arith.mulf %288, %280 : vector<8x32xf32>
    %300 = arith.addf %298, %299 : vector<8x32xf32>
    %301 = math.tanh %300 : vector<8x32xf32>
    %cst_138 = arith.constant 1.000000e+00 : f32
    %302 = vector.broadcast %cst_138 : f32 to vector<8x32xf32>
    %303 = arith.subf %302, %296 : vector<8x32xf32>
    %304 = arith.mulf %303, %301 : vector<8x32xf32>
    %305 = arith.mulf %296, %271 : vector<8x32xf32>
    %306 = arith.addf %304, %305 : vector<8x32xf32>
    %307 = arith.index_cast %275 : i32 to index
    %c0_139 = arith.constant 0 : index
    %308 = vector.load %arg33[%307, %c0_139] : memref<64x32xf32, #tpu.memory_space<vmem>>, vector<8x32xf32>
    tpu.vector_store %arg33[%307, %c0_139], %306 {strides = array<i32>} : memref<64x32xf32, #tpu.memory_space<vmem>>, vector<8x32xf32>,
    %c7_i32 = arith.constant 7 : i32
    %c8_i32_140 = arith.constant 8 : i32
    %309 = arith.muli %c7_i32, %c8_i32_140 : i32
    %310 = tpu.assume_multiple %309, 8 : i32
    %cst_141 = arith.constant dense<0.000000e+00> : vector<8x32xf32>
    %311 = tpu.matmul %306, %59, %cst_141 {dimension_numbers = #tpu.dot_dimension_numbers<[1], [0], [0], [1], [0, 0, 1, 1], [], []>} : vector<8x32xf32>, vector<32x32xf32>, vector<8x32xf32> -> vector<8x32xf32>
    %cst_142 = arith.constant dense<0.000000e+00> : vector<8x32xf32>
    %312 = tpu.matmul %306, %60, %cst_142 {dimension_numbers = #tpu.dot_dimension_numbers<[1], [0], [0], [1], [0, 0, 1, 1], [], []>} : vector<8x32xf32>, vector<32x32xf32>, vector<8x32xf32> -> vector<8x32xf32>
    %cst_143 = arith.constant dense<0.000000e+00> : vector<8x32xf32>
    %313 = tpu.matmul %306, %61, %cst_143 {dimension_numbers = #tpu.dot_dimension_numbers<[1], [0], [0], [1], [0, 0, 1, 1], [], []>} : vector<8x32xf32>, vector<32x32xf32>, vector<8x32xf32> -> vector<8x32xf32>
    %314 = vector.broadcast %62 : vector<1x32xf32> to vector<8x32xf32>
    %315 = arith.addf %313, %314 : vector<8x32xf32>
    %316 = arith.index_cast %310 : i32 to index
    %c0_144 = arith.constant 0 : index
    %317 = vector.load %arg30[%316, %c0_144] : memref<64x32xf32, #tpu.memory_space<vmem>>, vector<8x32xf32>
    %318 = arith.addf %317, %311 : vector<8x32xf32>
    %319 = arith.negf %318 : vector<8x32xf32>
    %320 = math.exp %319 : vector<8x32xf32>
    %cst_145 = arith.constant 1.000000e+00 : f32
    %321 = vector.broadcast %cst_145 : f32 to vector<8x32xf32>
    %322 = arith.addf %321, %320 : vector<8x32xf32>
    %323 = arith.divf %321, %322 : vector<8x32xf32>
    %324 = arith.index_cast %310 : i32 to index
    %c0_146 = arith.constant 0 : index
    %325 = vector.load %arg31[%324, %c0_146] : memref<64x32xf32, #tpu.memory_space<vmem>>, vector<8x32xf32>
    %326 = arith.addf %325, %312 : vector<8x32xf32>
    %327 = arith.negf %326 : vector<8x32xf32>
    %328 = math.exp %327 : vector<8x32xf32>
    %cst_147 = arith.constant 1.000000e+00 : f32
    %329 = vector.broadcast %cst_147 : f32 to vector<8x32xf32>
    %330 = arith.addf %329, %328 : vector<8x32xf32>
    %331 = arith.divf %329, %330 : vector<8x32xf32>
    %332 = arith.index_cast %310 : i32 to index
    %c0_148 = arith.constant 0 : index
    %333 = vector.load %arg32[%332, %c0_148] : memref<64x32xf32, #tpu.memory_space<vmem>>, vector<8x32xf32>
    %334 = arith.mulf %323, %315 : vector<8x32xf32>
    %335 = arith.addf %333, %334 : vector<8x32xf32>
    %336 = math.tanh %335 : vector<8x32xf32>
    %cst_149 = arith.constant 1.000000e+00 : f32
    %337 = vector.broadcast %cst_149 : f32 to vector<8x32xf32>
    %338 = arith.subf %337, %331 : vector<8x32xf32>
    %339 = arith.mulf %338, %336 : vector<8x32xf32>
    %340 = arith.mulf %331, %306 : vector<8x32xf32>
    %341 = arith.addf %339, %340 : vector<8x32xf32>
    %342 = arith.index_cast %310 : i32 to index
    %c0_150 = arith.constant 0 : index
    %343 = vector.load %arg33[%342, %c0_150] : memref<64x32xf32, #tpu.memory_space<vmem>>, vector<8x32xf32>
    tpu.vector_store %arg33[%342, %c0_150], %341 {strides = array<i32>} : memref<64x32xf32, #tpu.memory_space<vmem>>, vector<8x32xf32>,
    %c8_i32_151 = arith.constant 8 : i32
    %c0_152 = arith.constant 0 : index
    %c0_153 = arith.constant 0 : index
    %344 = vector.load %arg33[%c0_152, %c0_153] : memref<64x32xf32, #tpu.memory_space<vmem>>, vector<64x32xf32>
    %c0_154 = arith.constant 0 : index
    %c0_155 = arith.constant 0 : index
    %345 = vector.load %arg34[%c0_154, %c0_155] : memref<64x32xf32, #tpu.memory_space<vmem>>, vector<64x32xf32>
    %c0_156 = arith.constant 0 : index
    %c0_157 = arith.constant 0 : index
    %346 = vector.load %arg22[%c0_156, %c0_157] : memref<32x64xf32, #tpu.memory_space<vmem>>, vector<32x64xf32>
    %cst_158 = arith.constant dense<0.000000e+00> : vector<64x64xf32>
    %347 = tpu.matmul %344, %346, %cst_158 {dimension_numbers = #tpu.dot_dimension_numbers<[1], [0], [0], [1], [0, 0, 1, 1], [], []>} : vector<64x32xf32>, vector<32x64xf32>, vector<64x64xf32> -> vector<64x64xf32>
    %c0_159 = arith.constant 0 : index
    %c0_160 = arith.constant 0 : index
    %348 = vector.load %arg23[%c0_159, %c0_160] : memref<32x64xf32, #tpu.memory_space<vmem>>, vector<32x64xf32>
    %cst_161 = arith.constant dense<0.000000e+00> : vector<64x64xf32>
    %349 = tpu.matmul %345, %348, %cst_161 {dimension_numbers = #tpu.dot_dimension_numbers<[1], [0], [0], [1], [0, 0, 1, 1], [], []>} : vector<64x32xf32>, vector<32x64xf32>, vector<64x64xf32> -> vector<64x64xf32>
    %350 = arith.addf %347, %349 : vector<64x64xf32>
    %c0_162 = arith.constant 0 : index
    %c0_163 = arith.constant 0 : index
    %351 = vector.load %arg24[%c0_162, %c0_163] : memref<1x64xf32, #tpu.memory_space<vmem>>, vector<1x64xf32>
    %352 = vector.broadcast %351 : vector<1x64xf32> to vector<64x64xf32>
    %353 = arith.addf %350, %352 : vector<64x64xf32>
    %cst_164 = arith.constant 0.000000e+00 : f32
    %354 = vector.broadcast %cst_164 : f32 to vector<64x64xf32>
    %355 = arith.maximumf %353, %354 : vector<64x64xf32>
    %c0_165 = arith.constant 0 : index
    %c0_166 = arith.constant 0 : index
    %356 = vector.load %arg25[%c0_165, %c0_166] : memref<64x64xf32, #tpu.memory_space<vmem>>, vector<64x64xf32>
    %cst_167 = arith.constant dense<0.000000e+00> : vector<64x64xf32>
    %357 = tpu.matmul %355, %356, %cst_167 {dimension_numbers = #tpu.dot_dimension_numbers<[1], [0], [0], [1], [0, 0, 1, 1], [], []>} : vector<64x64xf32>, vector<64x64xf32>, vector<64x64xf32> -> vector<64x64xf32>
    %c0_168 = arith.constant 0 : index
    %c0_169 = arith.constant 0 : index
    %358 = vector.load %arg26[%c0_168, %c0_169] : memref<1x64xf32, #tpu.memory_space<vmem>>, vector<1x64xf32>
    %359 = vector.broadcast %358 : vector<1x64xf32> to vector<64x64xf32>
    %360 = arith.addf %357, %359 : vector<64x64xf32>
    %cst_170 = arith.constant 0.000000e+00 : f32
    %361 = vector.broadcast %cst_170 : f32 to vector<64x64xf32>
    %362 = arith.maximumf %360, %361 : vector<64x64xf32>
    %c0_171 = arith.constant 0 : index
    %c0_172 = arith.constant 0 : index
    %363 = vector.load %arg27[%c0_171, %c0_172] : memref<64x128xf32, #tpu.memory_space<vmem>>, vector<64x128xf32>
    %cst_173 = arith.constant dense<0.000000e+00> : vector<64x128xf32>
    %364 = tpu.matmul %362, %363, %cst_173 {dimension_numbers = #tpu.dot_dimension_numbers<[1], [0], [0], [1], [0, 0, 1, 1], [], []>} : vector<64x64xf32>, vector<64x128xf32>, vector<64x128xf32> -> vector<64x128xf32>
    %c0_174 = arith.constant 0 : index
    %c0_175 = arith.constant 0 : index
    %365 = vector.load %arg28[%c0_174, %c0_175] : memref<1x128xf32, #tpu.memory_space<vmem>>, vector<1x128xf32>
    %366 = vector.broadcast %365 : vector<1x128xf32> to vector<64x128xf32>
    %367 = arith.addf %364, %366 : vector<64x128xf32>
    %c0_176 = arith.constant 0 : index
    %c0_177 = arith.constant 0 : index
    %c0_178 = arith.constant 0 : index
    %368 = vector.load %arg29[%c0_176, %c0_177, %c0_178] : memref<1x64x128xf32, #tpu.memory_space<vmem>>, vector<1x64x128xf32>
    %369 = vector.shape_cast %368 : vector<1x64x128xf32> to vector<64x128xf32>
    %370 = vector.shape_cast %367 : vector<64x128xf32> to vector<1x64x128xf32>
    tpu.vector_store %arg29[%c0_176, %c0_177, %c0_178], %370 {strides = array<i32>} : memref<1x64x128xf32, #tpu.memory_space<vmem>>, vector<1x64x128xf32>,
    return
  }
  func.func @transform_0(%arg0: i32) -> (i32, i32, i32) {
    %c0_i32 = arith.constant 0 : i32
    %c0_i32_0 = arith.constant 0 : i32
    %c0_i32_1 = arith.constant 0 : i32
    return %arg0, %c0_i32, %c0_i32_0 : i32, i32, i32
  }
  func.func @transform_1(%arg0: i32) -> (i32, i32, i32) {
    %c0_i32 = arith.constant 0 : i32
    %c0_i32_0 = arith.constant 0 : i32
    %c0_i32_1 = arith.constant 0 : i32
    return %arg0, %c0_i32, %c0_i32_0 : i32, i32, i32
  }
  func.func @transform_2(%arg0: i32) -> (i32, i32, i32) {
    %c0_i32 = arith.constant 0 : i32
    %c0_i32_0 = arith.constant 0 : i32
    %c0_i32_1 = arith.constant 0 : i32
    return %arg0, %c0_i32, %c0_i32_0 : i32, i32, i32
  }
  func.func @transform_3(%arg0: i32) -> (i32, i32, i32) {
    %c0_i32 = arith.constant 0 : i32
    %c0_i32_0 = arith.constant 0 : i32
    %c0_i32_1 = arith.constant 0 : i32
    return %arg0, %c0_i32, %c0_i32_0 : i32, i32, i32
  }
  func.func @transform_4(%arg0: i32) -> (i32, i32) {
    %c0_i32 = arith.constant 0 : i32
    %c0_i32_0 = arith.constant 0 : i32
    %c0_i32_1 = arith.constant 0 : i32
    return %c0_i32, %c0_i32_0 : i32, i32
  }
  func.func @transform_5(%arg0: i32) -> (i32, i32) {
    %c0_i32 = arith.constant 0 : i32
    %c0_i32_0 = arith.constant 0 : i32
    %c0_i32_1 = arith.constant 0 : i32
    return %c0_i32, %c0_i32_0 : i32, i32
  }
  func.func @transform_6(%arg0: i32) -> (i32, i32) {
    %c0_i32 = arith.constant 0 : i32
    %c0_i32_0 = arith.constant 0 : i32
    %c0_i32_1 = arith.constant 0 : i32
    return %c0_i32, %c0_i32_0 : i32, i32
  }
  func.func @transform_7(%arg0: i32) -> (i32, i32) {
    %c0_i32 = arith.constant 0 : i32
    %c0_i32_0 = arith.constant 0 : i32
    %c0_i32_1 = arith.constant 0 : i32
    return %c0_i32, %c0_i32_0 : i32, i32
  }
  func.func @transform_8(%arg0: i32) -> (i32, i32) {
    %c0_i32 = arith.constant 0 : i32
    %c0_i32_0 = arith.constant 0 : i32
    %c0_i32_1 = arith.constant 0 : i32
    return %c0_i32, %c0_i32_0 : i32, i32
  }
  func.func @transform_9(%arg0: i32) -> (i32, i32) {
    %c0_i32 = arith.constant 0 : i32
    %c0_i32_0 = arith.constant 0 : i32
    %c0_i32_1 = arith.constant 0 : i32
    return %c0_i32, %c0_i32_0 : i32, i32
  }
  func.func @transform_10(%arg0: i32) -> (i32, i32) {
    %c0_i32 = arith.constant 0 : i32
    %c0_i32_0 = arith.constant 0 : i32
    %c0_i32_1 = arith.constant 0 : i32
    return %c0_i32, %c0_i32_0 : i32, i32
  }
  func.func @transform_11(%arg0: i32) -> (i32, i32) {
    %c0_i32 = arith.constant 0 : i32
    %c0_i32_0 = arith.constant 0 : i32
    %c0_i32_1 = arith.constant 0 : i32
    return %c0_i32, %c0_i32_0 : i32, i32
  }
  func.func @transform_12(%arg0: i32) -> (i32, i32) {
    %c0_i32 = arith.constant 0 : i32
    %c0_i32_0 = arith.constant 0 : i32
    %c0_i32_1 = arith.constant 0 : i32
    return %c0_i32, %c0_i32_0 : i32, i32
  }
  func.func @transform_13(%arg0: i32) -> (i32, i32) {
    %c0_i32 = arith.constant 0 : i32
    %c0_i32_0 = arith.constant 0 : i32
    %c0_i32_1 = arith.constant 0 : i32
    return %c0_i32, %c0_i32_0 : i32, i32
  }
  func.func @transform_14(%arg0: i32) -> (i32, i32) {
    %c0_i32 = arith.constant 0 : i32
    %c0_i32_0 = arith.constant 0 : i32
    %c0_i32_1 = arith.constant 0 : i32
    return %c0_i32, %c0_i32_0 : i32, i32
  }
  func.func @transform_15(%arg0: i32) -> (i32, i32) {
    %c0_i32 = arith.constant 0 : i32
    %c0_i32_0 = arith.constant 0 : i32
    %c0_i32_1 = arith.constant 0 : i32
    return %c0_i32, %c0_i32_0 : i32, i32
  }
  func.func @transform_16(%arg0: i32) -> (i32, i32) {
    %c0_i32 = arith.constant 0 : i32
    %c0_i32_0 = arith.constant 0 : i32
    %c0_i32_1 = arith.constant 0 : i32
    return %c0_i32, %c0_i32_0 : i32, i32
  }
  func.func @transform_17(%arg0: i32) -> (i32, i32) {
    %c0_i32 = arith.constant 0 : i32
    %c0_i32_0 = arith.constant 0 : i32
    %c0_i32_1 = arith.constant 0 : i32
    return %c0_i32, %c0_i32_0 : i32, i32
  }
  func.func @transform_18(%arg0: i32) -> (i32, i32) {
    %c0_i32 = arith.constant 0 : i32
    %c0_i32_0 = arith.constant 0 : i32
    %c0_i32_1 = arith.constant 0 : i32
    return %c0_i32, %c0_i32_0 : i32, i32
  }
  func.func @transform_19(%arg0: i32) -> (i32, i32) {
    %c0_i32 = arith.constant 0 : i32
    %c0_i32_0 = arith.constant 0 : i32
    %c0_i32_1 = arith.constant 0 : i32
    return %c0_i32, %c0_i32_0 : i32, i32
  }
  func.func @transform_20(%arg0: i32) -> (i32, i32) {
    %c0_i32 = arith.constant 0 : i32
    %c0_i32_0 = arith.constant 0 : i32
    %c0_i32_1 = arith.constant 0 : i32
    return %c0_i32, %c0_i32_0 : i32, i32
  }
  func.func @transform_21(%arg0: i32) -> (i32, i32) {
    %c0_i32 = arith.constant 0 : i32
    %c0_i32_0 = arith.constant 0 : i32
    %c0_i32_1 = arith.constant 0 : i32
    return %c0_i32, %c0_i32_0 : i32, i32
  }
  func.func @transform_22(%arg0: i32) -> (i32, i32) {
    %c0_i32 = arith.constant 0 : i32
    %c0_i32_0 = arith.constant 0 : i32
    %c0_i32_1 = arith.constant 0 : i32
    return %c0_i32, %c0_i32_0 : i32, i32
  }
  func.func @transform_23(%arg0: i32) -> (i32, i32) {
    %c0_i32 = arith.constant 0 : i32
    %c0_i32_0 = arith.constant 0 : i32
    %c0_i32_1 = arith.constant 0 : i32
    return %c0_i32, %c0_i32_0 : i32, i32
  }
  func.func @transform_24(%arg0: i32) -> (i32, i32) {
    %c0_i32 = arith.constant 0 : i32
    %c0_i32_0 = arith.constant 0 : i32
    %c0_i32_1 = arith.constant 0 : i32
    return %c0_i32, %c0_i32_0 : i32, i32
  }
  func.func @transform_25(%arg0: i32) -> (i32, i32) {
    %c0_i32 = arith.constant 0 : i32
    %c0_i32_0 = arith.constant 0 : i32
    %c0_i32_1 = arith.constant 0 : i32
    return %c0_i32, %c0_i32_0 : i32, i32
  }
  func.func @transform_26(%arg0: i32) -> (i32, i32) {
    %c0_i32 = arith.constant 0 : i32
    %c0_i32_0 = arith.constant 0 : i32
    %c0_i32_1 = arith.constant 0 : i32
    return %c0_i32, %c0_i32_0 : i32, i32
  }
  func.func @transform_27(%arg0: i32) -> (i32, i32) {
    %c0_i32 = arith.constant 0 : i32
    %c0_i32_0 = arith.constant 0 : i32
    %c0_i32_1 = arith.constant 0 : i32
    return %c0_i32, %c0_i32_0 : i32, i32
  }
  func.func @transform_28(%arg0: i32) -> (i32, i32, i32) {
    %c0_i32 = arith.constant 0 : i32
    %c0_i32_0 = arith.constant 0 : i32
    %c0_i32_1 = arith.constant 0 : i32
    return %arg0, %c0_i32, %c0_i32_0 : i32, i32, i32
  }
}

</mosaic_0001>

<bundles_post_ra>
// kernel: critic_rnn_forward.1
= control target key start
LH: loop header
LB: loop body
LE: loop exit
PB: predicated region body
PF: predicated region fallthrough
CT: control target
= control target key end

     0   :  { %vm151_vm0 = vcmask 1043456   ;;  %vm126_vm1 = vcmask 31744   ;;  %v2339_v2 = vmov 0   ;;  %vm282_vm2 = vcmask 130048   ;;  %s3270_s4 = inlined_call_operand.vmem [shape: f32[4,8], index: 4, kind: input, shape index: {}]   ;;  %s3271_s8 = inlined_call_operand.vmem [shape: f32[16,16], index: 8, kind: input, shape index: {}]   ;;  %s3272_s0 = inlined_call_operand.vmem [shape: f32[1,64,4], index: 0, kind: input, shape index: {}]   ;;  %s3273_s1 = inlined_call_operand.vmem [shape: f32[1,64,1], index: 1, kind: input, shape index: {}]   ;;  %s3274_s2 = inlined_call_operand.vmem [shape: f32[1,64,16], index: 2, kind: input, shape index: {}]   ;;  %s3275_s6 = inlined_call_operand.vmem [shape: f32[1,8], index: 6, kind: input, shape index: {}]   ;;  %s3276_s7 = inlined_call_operand.vmem [shape: f32[1,8], index: 7, kind: input, shape index: {}]   ;;  %s3277_s5 = inlined_call_operand.vmem [shape: f32[1,8], index: 5, kind: input, shape index: {}]   ;;  %s3278_s9 = inlined_call_operand.vmem [shape: f32[1,16], index: 9, kind: input, shape index: {}]   ;;  %s3279_s12 = inlined_call_operand.vmem [shape: f32[16,96], index: 12, kind: input, shape index: {}]   ;;  %s3280_s11 = inlined_call_operand.vmem [shape: f32[8,96], index: 11, kind: input, shape index: {}]   ;;  %s3281_s10 = inlined_call_operand.vmem [shape: f32[8,96], index: 10, kind: input, shape index: {}]   ;;  %s3282_s13 = inlined_call_operand.vmem [shape: f32[1,96], index: 13, kind: input, shape index: {}]   ;;  %s3283_s14 = inlined_call_operand.vmem [shape: f32[32,32], index: 14, kind: input, shape index: {}]   ;;  %s3284_s15 = inlined_call_operand.vmem [shape: f32[32,32], index: 15, kind: input, shape index: {}]   ;;  %s3285_s16 = inlined_call_operand.vmem [shape: f32[32,32], index: 16, kind: input, shape index: {}]   ;;  %s3286_s17 = inlined_call_operand.vmem [shape: f32[1,32], index: 17, kind: input, shape index: {}]   ;;  %s3287_s19 = inlined_call_operand.vmem [shape: f32[4,32], index: 19, kind: input, shape index: {}]   ;;  %s3288_s18 = inlined_call_operand.vmem [shape: f32[16,32], index: 18, kind: input, shape index: {}]   ;;  %s3289_s3 = inlined_call_operand.vmem [shape: f32[1,64,4], index: 3, kind: input, shape index: {}]   ;;  %s3290_s20 = inlined_call_operand.vmem [shape: f32[1,32], index: 20, kind: input, shape index: {}]   ;;  %s3291_s22 = inlined_call_operand.vmem [shape: f32[32,64], index: 22, kind: input, shape index: {}]   ;;  %s3292_s21 = inlined_call_operand.vmem [shape: f32[32,64], index: 21, kind: input, shape index: {}]   ;;  %s3293_s23 = inlined_call_operand.vmem [shape: f32[1,64], index: 23, kind: input, shape index: {}]   ;;  %s3294_s25 = inlined_call_operand.vmem [shape: f32[1,64], index: 25, kind: input, shape index: {}]   ;;  %s3295_s24 = inlined_call_operand.vmem [shape: f32[64,64], index: 24, kind: input, shape index: {}]   ;;  %s3296_s26 = inlined_call_operand.vmem [shape: f32[64,128], index: 26, kind: input, shape index: {}]   ;;  %s3297_s27 = inlined_call_operand.vmem [shape: f32[1,128], index: 27, kind: input, shape index: {}]   ;;  %s3298_s28 = inlined_call_operand.vmem [shape: f32[1,64,128], index: 28, kind: output, shape index: {}]  }
   0x1   :  { %3304 = sst [smem:[#allocation7_spill]] %s3270_s4  ;;  %2233 = vset.pattern.permute.xlu0 %v2339_v2  ;;  %2234 = vset.pattern.permute.xlu2 %v2339_v2  ;;  %vm358_vm3 = vcmask 64512   ;;  %v2648_v57 = vld [vmem:[%s3283_s14 + $0x18] sm:$0xff]  ;;  %v2653_v58 = vld [vmem:[%s3283_s14 + $0x10] sm:$0xff]  ;;  %v2661_v63 = vld [vmem:[%s3283_s14 + $0x8] sm:$0xff]  ;;  %vm576_vm4 = vcmask 261120  }
   0x2   :  { %3305 = sst [smem:[#allocation8_spill]] %s3271_s8  ;;  %2235 = vset.pattern.permute.xlu1 %v2339_v2 }
   0x3   :  { %3306 = sst [smem:[#allocation9_spill]] %s3272_s0 }
   0x4   :  { %3307 = sst [smem:[#allocation10_spill]] %s3273_s1 }
   0x5   :  { %3308 = sst [smem:[#allocation11_spill]] %s3274_s2 }
   0x6   :  { %3309 = sst [smem:[#allocation12_spill]] %s3275_s6 }
   0x7   :  { %3310 = sst [smem:[#allocation13_spill]] %s3276_s7 }
   0x8   :  { %3311 = sst [smem:[#allocation14_spill]] %s3277_s5 }
   0x9   :  { %3312 = sst [smem:[#allocation15_spill]] %s3278_s9 }
   0xa   :  { %3313 = sst [smem:[#allocation16_spill]] %s3279_s12 }
   0xb   :  { %3314 = sst [smem:[#allocation17_spill]] %s3280_s11  ;;  %s2342_s11 = smov 64  }
   0xc   :  { %3315 = sst [smem:[#allocation18_spill]] %s3281_s10 }
   0xd   :  { %3316 = sst [smem:[#allocation19_spill]] %s3282_s13 }
   0xe   :  { %s3317_s12 = sld [smem:[#allocation7_spill]] }
   0xf   :  { %s3318_s8 = sld [smem:[#allocation8_spill]] }
  0x10   :  { %s3319_s10 = sld [smem:[#allocation9_spill]] }
  0x11   :  { %s3320_s1 = sld [smem:[#allocation10_spill]] }
  0x12   :  { %s3321_s6 = sld [smem:[#allocation11_spill]] }
  0x13   :  { %s3322_s7 = sld [smem:[#allocation16_spill]] }
  0x14   :  { %v121_v0 = vld [vmem:[%s3317_s12] sm:$0xf]  ;;  %s3323_s30 = sld [smem:[#allocation17_spill]] }
  0x15   :  { %v277_v1 = vld [vmem:[%s3318_s8 + $0x8] sm:$0xff]  ;;  %2102 = vmatpush.msk.msra.mxu0 %vm151_vm0, %v121_v0  ;;  %v276_v4 = vld [vmem:[%s3318_s8] sm:$0xff]  ;;  %s3324_s0 = sld [smem:[#allocation18_spill]] }
  0x16   :  { %v89_v3 = vld [vmem:[%s3319_s10] sm:$0xff]  ;;  %321 = vmatpush.msra.mxu1 %v277_v1  ;;  %v90_v7 = vld [vmem:[%s3319_s10 + $0x8] sm:$0xff]  ;;  %v91_v12 = vld [vmem:[%s3319_s10 + $0x10] sm:$0xff]  ;;  %s3325_s5 = sld [smem:[#allocation12_spill]] }
  0x17   :  { %v97_v5 = vld [vmem:[%s3320_s1] sm:$0xff]  ;;  %2103 = vmatmul.msk.f32.vlgmr.msra.gmra.mxu0 %vm126_vm1, %v89_v3  ;;  %v98_v8 = vld [vmem:[%s3320_s1 + $0x8] sm:$0xff]  ;;  %v99_v14 = vld [vmem:[%s3320_s1 + $0x10] sm:$0xff]  ;;  %s3326_s9 = sld [smem:[#allocation13_spill]] }
  0x18   :  { %v2507_v6 = vld [vmem:[%s3321_s6] sm:$0xff]  ;;  %207 = vperm.xlu0 %2233, %v97_v5   ;;  %322 = vmatpush.msra.mxu1 %v276_v4  ;;  %v2521_v9 = vld [vmem:[%s3321_s6 + $0x8] sm:$0xff]  ;;  %v2529_v10 = vld [vmem:[%s3321_s6 + $0x10] sm:$0xff]  ;;  %s3329_s8 = sld [smem:[#allocation19_spill]] }
  0x19   :  { %2111 = vmatmul.msk.f32.vlgmr.msra.gmra.mxu1 %vm282_vm2, %v2507_v6  ;;  %v2536_v11 = vld [vmem:[%s3321_s6 + $0x18] sm:$0xff]  ;;  %v490_v13 = vld [vmem:[%s3322_s7 + $0x8] sm:$0xff]  ;;  %v489_v15 = vld [vmem:[%s3322_s7] sm:$0xff]  ;;  %217 = vperm.xlu2 %2234, %v99_v14  }
  0x1a   :  { %529 = vmatpush.msrb.mxu0 %v490_v13  ;;  %v2556_v16 = vld [vmem:[%s3321_s6 + $0x20] sm:$0xff]  ;;  %v92_v17 = vld [vmem:[%s3319_s10 + $0x18] sm:$0xff]  ;;  %v2567_v18 = vld [vmem:[%s3321_s6 + $0x28] sm:$0xff] }
  0x1b   :  { %v93_v19 = vld [vmem:[%s3319_s10 + $0x20] sm:$0xff]  ;;  %v2578_v20 = vld [vmem:[%s3321_s6 + $0x30] sm:$0xff]  ;;  %v94_v21 = vld [vmem:[%s3319_s10 + $0x28] sm:$0xff] }
  0x1c   :  { %530 = vmatpush.msrb.mxu0 %v489_v15  ;;  %v2589_v22 = vld [vmem:[%s3321_s6 + $0x38] sm:$0xff]  ;;  %v95_v23 = vld [vmem:[%s3319_s10 + $0x30] sm:$0xff]  ;;  %v357_v24 = vld [vmem:[%s3323_s30] sm:$0xff]  ;;  %s3327_s30 = sld [smem:[#allocation14_spill]] }
  0x1d   :  { %398 = vmatpush.msra.mxu2 %v357_v24  ;;  %v96_v25 = vld [vmem:[%s3319_s10 + $0x38] sm:$0xff]  ;;  %v356_v26 = vld [vmem:[%s3324_s0] sm:$0xff]  ;;  %s3328_s6 = sld [smem:[#allocation15_spill]] }
  0x1e   :  { %463 = vmatpush.msra.mxu3 %v356_v26  ;;  %v2610_v27 = vld [vmem:[%s3325_s5] ss:$0 sm:$0xff]  ;;  %825 = vmatpush.msra.mxu0 %v2648_v57  ;;  %v2691_v15 = vld [vmem:[%s3285_s16 + $0x18] sm:$0xff]  ;;  %v2716_v26 = vld [vmem:[%s3285_s16 + $0x8] sm:$0xff] }
  0x1f   :  { %2104 = vmatmul.msk.f32.gmra.mxu0 %vm126_vm1, %v90_v7  ;;  %v2615_v28 = vld [vmem:[%s3326_s9] ss:$0 sm:$0xff] }
  0x20   :  { %212 = vperm.xlu0 %2233, %v98_v8   ;;  %826 = vmatpush.msra.mxu0 %v2653_v58  ;;  %v2669_v4 = vld [vmem:[%s3283_s14] sm:$0xff]  ;;  %v2679_v8 = vld [vmem:[%s3284_s15 + $0x18] sm:$0xff] }
  0x21   :  { %2112 = vmatmul.msk.f32.gmra.mxu1 %vm282_vm2, %v2521_v9 }
  0x22   :  { %v2623_v34 = vld [vmem:[%s3327_s30] ss:$0 sm:$0xff]  ;;  %827 = vmatpush.msra.mxu0 %v2661_v63  ;;  %845 = vmatpush.msrb.mxu1 %v2679_v8 }
  0x23   :  { %v2629_v36 = vld [vmem:[%s3328_s6] ss:$0 sm:$0xff]  ;;  %s2341_s6 = smov 96  }
  0x24   :  { %828 = vmatpush.msra.mxu0 %v2669_v4 }
  0x27   :  { %2105 = vmatmul.msk.f32.gmra.mxu0 %vm126_vm1, %v91_v12  ;;  %v2684_v12 = vld [vmem:[%s3284_s15 + $0x10] sm:$0xff] }
  0x28   :  { %846 = vmatpush.msrb.mxu1 %v2684_v12 }
  0x29   :  { %2113 = vmatmul.msk.f32.gmra.mxu1 %vm282_vm2, %v2529_v10 }
  0x2f   :  { %2106 = vmatmul.msk.f32.gmra.mxu0 %vm126_vm1, %v92_v17  ;;  %v2696_v17 = vld [vmem:[%s3284_s15 + $0x8] sm:$0xff] }
  0x30   :  { %847 = vmatpush.msrb.mxu1 %v2696_v17 }
  0x31   :  { %2114 = vmatmul.msk.f32.gmra.mxu1 %vm282_vm2, %v2536_v11 }
  0x37   :  { %2107 = vmatmul.msk.f32.gmra.mxu0 %vm126_vm1, %v93_v19 }
  0x39   :  { %2115 = vmatmul.msk.f32.gmra.mxu1 %vm282_vm2, %v2556_v16 }
  0x3f   :  { %2108 = vmatmul.msk.f32.gmra.mxu0 %vm126_vm1, %v94_v21 }
  0x41   :  { %2116 = vmatmul.msk.f32.gmra.mxu1 %vm282_vm2, %v2567_v18 }
  0x47   :  { %2109 = vmatmul.msk.f32.gmra.mxu0 %vm126_vm1, %v95_v23  ;;  %v2703_v23 = vld [vmem:[%s3285_s16 + $0x10] sm:$0xff] }
  0x49   :  { %2117 = vmatmul.msk.f32.gmra.mxu1 %vm282_vm2, %v2578_v20 }
  0x4f   :  { %2110 = vmatmul.msk.f32.gmra.mxu0 %vm126_vm1, %v96_v25  ;;  %v2709_v25 = vld [vmem:[%s3284_s15] sm:$0xff] }
  0x50   :  { %848 = vmatpush.msrb.mxu1 %v2709_v25 }
  0x51   :  { %2118 = vmatmul.msk.f32.gmra.mxu1 %vm282_vm2, %v2589_v22 }
  0x52   :  { %868 = vmatpush.msra.mxu1 %v2691_v15 }
  0x54   :  { %869 = vmatpush.msra.mxu1 %v2703_v23 }
  0x56   :  { %870 = vmatpush.msra.mxu1 %v2716_v26 }
  0x73   :  { %v218_v59 = vpop.permute.xlu2 %217 }
  0x74   :  { %v250_v61 = vmul.f32 %v2610_v27, %v218_v59 }
  0x76   :  { %v262_v1 = vadd.f32 %v2615_v28, %v250_v61 }
  0x78   :  { %v270_v5 = vmax.f32 %v262_v1, 0.0 }
  0x8a   :  { %v208_v29 = vpop.permute.xlu0 %207 }
  0x8b   :  { %v248_v30 = vmul.f32 %v2610_v27, %v208_v29 }
  0x8d   :  { %v260_v31 = vadd.f32 %v2615_v28, %v248_v30  ;;  %v2340_v30 = vmov 0.0  }
  0x8e   :  { %849 = vmatmul.f32.vlgmr.msrb.gmra.mxu1 %v2340_v30 }
  0x8f   :  { %v268_v32 = vmax.f32 %v260_v31, 0.0  ;;  %v2725_v31 = vld [vmem:[%s3285_s16] sm:$0xff] }
  0x90   :  { %871 = vmatpush.msra.mxu1 %v2725_v31 }
  0x91   :  { %2119 = vmatmul.msk.f32.vlgmr.msra.gmra.mxu2 %vm358_vm3, %v268_v32 }
  0x92   :  { %v213_v33 = vpop.permute.xlu0 %212  ;;  %942 = vmatpush.msrb.mxu1 %v2648_v57 }
  0x93   :  { %v249_v35 = vmul.f32 %v2610_v27, %v213_v33 }
  0x94   :  { %v172_v38 = vpop.f32.mrf.mxu0  ;;  %943 = vmatpush.msrb.mxu1 %v2653_v58 }
  0x95   :  { %v261_v37 = vadd.f32 %v2615_v28, %v249_v35  ;;  %v173_v39 = vadd.f32 %v2623_v34, %v172_v38 }
  0x96   :  { %v324_v41 = vpop.f32.mrf.mxu1  ;;  %872 = vmatmul.f32.vlgmr.msra.gmra.mxu1 %v2340_v30 }
  0x97   :  { %v269_v40 = vmax.f32 %v261_v37, 0.0  ;;  %v196_v42 = vmax.f32 %v173_v39, 0.0  ;;  %v325_v43 = vadd.f32 %v2629_v36, %v324_v41  ;;  %944 = vmatpush.msrb.mxu1 %v2661_v63 }
  0x99   :  { %2120 = vmatmul.msk.f32.gmra.mxu2 %vm358_vm3, %v269_v40  ;;  %v348_v44 = vmax.f32 %v325_v43, 0.0  ;;  %2127 = vmatmul.msk.f32.vlgmr.msra.gmra.mxu3 %vm358_vm3, %v196_v42 }
  0x9a   :  { %945 = vmatpush.msrb.mxu1 %v2669_v4 }
  0x9b   :  { %2135 = vmatmul.msk.f32.vlgmr.msrb.gmra.mxu0 %vm282_vm2, %v348_v44 }
  0x9c   :  { %v175_v45 = vpop.f32.mrf.mxu0  ;;  %1100 = vmatpush.msrb.mxu0 %v2691_v15  ;;  %962 = vmatpush.msra.mxu1 %v2679_v8 }
  0x9d   :  { %v176_v46 = vadd.f32 %v2623_v34, %v175_v45 }
  0x9e   :  { %v327_v47 = vpop.f32.mrf.mxu1  ;;  %1101 = vmatpush.msrb.mxu0 %v2703_v23  ;;  %963 = vmatpush.msra.mxu1 %v2684_v12 }
  0x9f   :  { %v197_v48 = vmax.f32 %v176_v46, 0.0  ;;  %v328_v49 = vadd.f32 %v2629_v36, %v327_v47 }
  0xa0   :  { %1102 = vmatpush.msrb.mxu0 %v2716_v26  ;;  %964 = vmatpush.msra.mxu1 %v2696_v17 }
  0xa1   :  { %v349_v50 = vmax.f32 %v328_v49, 0.0  ;;  %2128 = vmatmul.msk.f32.gmra.mxu3 %vm358_vm3, %v197_v48  ;;  %2121 = vmatmul.msk.f32.gmra.mxu2 %vm358_vm3, %v270_v5  ;;  %v100_v5 = vld [vmem:[%s3320_s1 + $0x18] sm:$0xff] }
  0xa2   :  { %1103 = vmatpush.msrb.mxu0 %v2725_v31  ;;  %965 = vmatpush.msra.mxu1 %v2709_v25 }
  0xa3   :  { %2136 = vmatmul.msk.f32.gmra.mxu0 %vm282_vm2, %v349_v50 }
  0xa4   :  { %v178_v60 = vpop.f32.mrf.mxu0 }
  0xa5   :  { %v179_v62 = vadd.f32 %v2623_v34, %v178_v60 }
  0xa6   :  { %v330_v51 = vpop.f32.mrf.mxu1 }
  0xa7   :  { %v331_v52 = vadd.f32 %v2629_v36, %v330_v51  ;;  %v198_v2 = vmax.f32 %v179_v62, 0.0 }
  0xa9   :  { %v350_v53 = vmax.f32 %v331_v52, 0.0  ;;  %2129 = vmatmul.msk.f32.gmra.mxu3 %vm358_vm3, %v198_v2  ;;  %v102_v2 = vld [vmem:[%s3320_s1 + $0x28] sm:$0xff] }
  0xab   :  { %2137 = vmatmul.msk.f32.gmra.mxu0 %vm282_vm2, %v350_v53 }
  0xac   :  { %v181_v13 = vpop.f32.mrf.mxu0 }
  0xad   :  { %v182_v14 = vadd.f32 %v2623_v34, %v181_v13 }
  0xae   :  { %v333_v54 = vpop.f32.mrf.mxu1 }
  0xaf   :  { %v334_v55 = vadd.f32 %v2629_v36, %v333_v54  ;;  %v199_v21 = vmax.f32 %v182_v14, 0.0 }
  0xb1   :  { %v351_v56 = vmax.f32 %v334_v55, 0.0  ;;  %2130 = vmatmul.msk.f32.gmra.mxu3 %vm358_vm3, %v199_v21  ;;  %v2759_v55 = vld [vmem:[%s3329_s8] ss:$0 sm:$0xff] }
  0xb3   :  { %2138 = vmatmul.msk.f32.gmra.mxu0 %vm282_vm2, %v351_v56 }
  0xb4   :  { %v184_v32 = vpop.f32.mrf.mxu0 }
  0xb5   :  { %v185_v33 = vadd.f32 %v2623_v34, %v184_v32 }
  0xb6   :  { %v336_v0 = vpop.f32.mrf.mxu1 }
  0xb7   :  { %v337_v3 = vadd.f32 %v2629_v36, %v336_v0  ;;  %v200_v37 = vmax.f32 %v185_v33, 0.0 }
  0xb9   :  { %v352_v7 = vmax.f32 %v337_v3, 0.0  ;;  %2131 = vmatmul.msk.f32.gmra.mxu3 %vm358_vm3, %v200_v37  ;;  %v101_v3 = vld [vmem:[%s3320_s1 + $0x20] sm:$0xff] }
  0xbb   :  { %2139 = vmatmul.msk.f32.gmra.mxu0 %vm282_vm2, %v352_v7  ;;  %v103_v7 = vld [vmem:[%s3320_s1 + $0x30] sm:$0xff] }
  0xbc   :  { %v187_v40 = vpop.f32.mrf.mxu0 }
  0xbd   :  { %v188_v41 = vadd.f32 %v2623_v34, %v187_v40 }
  0xbe   :  { %v339_v19 = vpop.f32.mrf.mxu1 }
  0xbf   :  { %v340_v24 = vadd.f32 %v2629_v36, %v339_v19  ;;  %v201_v43 = vmax.f32 %v188_v41, 0.0 }
  0xc1   :  { %v353_v29 = vmax.f32 %v340_v24, 0.0  ;;  %2132 = vmatmul.msk.f32.gmra.mxu3 %vm358_vm3, %v201_v43 }
  0xc3   :  { %2140 = vmatmul.msk.f32.gmra.mxu0 %vm282_vm2, %v353_v29  ;;  %v104_v29 = vld [vmem:[%s3320_s1 + $0x38] sm:$0xff] }
  0xc6   :  { %v342_v35 = vpop.f32.mrf.mxu1 }
  0xc7   :  { %v343_v38 = vadd.f32 %v2629_v36, %v342_v35 }
  0xc9   :  { %v354_v39 = vmax.f32 %v343_v38, 0.0 }
  0xcb   :  { %2141 = vmatmul.msk.f32.gmra.mxu0 %vm282_vm2, %v354_v39 }
  0xce   :  { %v345_v42 = vpop.f32.mrf.mxu1 }
  0xcf   :  { %v346_v44 = vadd.f32 %v2629_v36, %v345_v42  ;;  %v190_v36 = vpop.f32.mrf.mxu0 }
  0xd0   :  { %v191_v46 = vadd.f32 %v2623_v34, %v190_v36 }
  0xd1   :  { %v355_v45 = vmax.f32 %v346_v44, 0.0 }
  0xd2   :  { %v202_v47 = vmax.f32 %v191_v46, 0.0 }
  0xd3   :  { %2142 = vmatmul.msk.f32.gmra.mxu0 %vm282_vm2, %v355_v45 }
  0xd4   :  { %2133 = vmatmul.msk.f32.gmra.mxu3 %vm358_vm3, %v202_v47 }
  0xd7   :  { %v193_v48 = vpop.f32.mrf.mxu0 }
  0xd8   :  { %v194_v49 = vadd.f32 %v2623_v34, %v193_v48 }
  0xda   :  { %v203_v50 = vmax.f32 %v194_v49, 0.0 }
  0xdb   :  { %829 = vmatmul.f32.vlgmr.msra.gmra.mxu0 %v2340_v30 }
  0xdc   :  { %1296 = vmatpush.msra.mxu0 %v2648_v57  ;;  %2134 = vmatmul.msk.f32.gmra.mxu3 %vm358_vm3, %v203_v50 }
  0xde   :  { %1297 = vmatpush.msra.mxu0 %v2653_v58 }
  0xe0   :  { %1298 = vmatpush.msra.mxu0 %v2661_v63 }
  0xe2   :  { %1299 = vmatpush.msra.mxu0 %v2669_v4 }
 0x10b   :  { %v850_v48 = vpop.f32.mrf.mxu1 }
 0x114   :  { %v400_v51 = vpop.f32.mrf.mxu2 }
 0x118   :  { %v532_v52 = vpop.f32.mrf.mxu0 }
 0x11c   :  { %v465_v53 = vpop.f32.mrf.mxu3  ;;  %v403_v34 = vpop.f32.mrf.mxu2 }
 0x11d   :  { %v466_v54 = vadd.f32 %v465_v53, %v400_v51 }
 0x11f   :  { %v556_v56 = vadd.f32 %v532_v52, %v466_v54 }
 0x120   :  { %v535_v62 = vpop.f32.mrf.mxu0 }
 0x121   :  { %v568_v59 = vadd.f32 %v2759_v55, %v556_v56 }
 0x123   :  { %593 = vrot.lane.b32.xlu1 %v568_v59, %s2341_s6  ;;  %577 = vst.msk [vmem:[#allocation2] sm:$0xff] %vm576_vm4, %v568_v59 }
 0x124   :  { %v468_v60 = vpop.f32.mrf.mxu3  ;;  %v406_v14 = vpop.f32.mrf.mxu2 }
 0x125   :  { %v469_v61 = vadd.f32 %v468_v60, %v403_v34 }
 0x127   :  { %v557_v0 = vadd.f32 %v535_v62, %v469_v61 }
 0x128   :  { %v538_v13 = vpop.f32.mrf.mxu0 }
 0x129   :  { %v569_v1 = vadd.f32 %v2759_v55, %v557_v0 }
 0x12a   :  { %v876_v40 = vld [vmem:[#allocation2] sm:$0xff] }
 0x12b   :  { %627 = vrot.lane.b32.xlu0 %v569_v1, %s2342_s11  ;;  %578 = vst.msk [vmem:[#allocation2 + $0x8] sm:$0xff] %vm576_vm4, %v569_v1  ;;  %595 = vrot.lane.b32.xlu2 %v569_v1, %s2341_s6  ;;  %v2806_v1 = vld [vmem:[%s3286_s17] ss:$0 sm:$0xff] }
 0x12c   :  { %625 = vrot.lane.b32.xlu1 %v568_v59, %s2342_s11  ;;  %v471_v19 = vpop.f32.mrf.mxu3 }
 0x12d   :  { %v472_v21 = vadd.f32 %v471_v19, %v406_v14 }
 0x12f   :  { %v558_v24 = vadd.f32 %v538_v13, %v472_v21  ;;  %v873_v13 = vpop.f32.mrf.mxu1 }
 0x130   :  { %v2784_v30 = vpop.f32.mrf.mxu0 }
 0x131   :  { %v570_v32 = vadd.f32 %v2759_v55, %v558_v24  ;;  %v874_v24 = vadd.f32 %v2806_v1, %v873_v13 }
 0x133   :  { %232 = vperm.xlu0 %2233, %v102_v2   ;;  %227 = vperm.xlu2 %2234, %v101_v3   ;;  %579 = vst.msk [vmem:[#allocation2 + $0x10] sm:$0xff] %vm576_vm4, %v570_v32 }
 0x134   :  { %222 = vperm.xlu1 %2235, %v100_v5  }
 0x138   :  { %v2790_v33 = vpop.f32.mrf.mxu0 }
 0x13b   :  { %242 = vperm.xlu2 %2234, %v104_v29   ;;  %597 = vrot.lane.b32.xlu0 %v570_v32, %s2341_s6 }
 0x13c   :  { %237 = vperm.xlu1 %2235, %v103_v7  }
 0x140   :  { %v2792_v35 = vpop.f32.mrf.mxu0 }
 0x144   :  { %629 = vrot.lane.b32.xlu1 %v570_v32, %s2342_s11 }
 0x148   :  { %v2794_v37 = vpop.f32.mrf.mxu0 }
 0x150   :  { %v2796_v38 = vpop.f32.mrf.mxu0 }
 0x158   :  { %v830_v39 = vpop.f32.mrf.mxu0 }
 0x159   :  { %v877_v41 = vadd.f32 %v876_v40, %v830_v39 }
 0x15b   :  { %v2160_v42 = vmul.f32 -1.442695, %v877_v41 }
 0x15d   :  { %2246 = vpow2.f32 %v2160_v42 }
 0x163   :  { %v2247_v44 = vpop.eup %2246 }
 0x164   :  { %v881_v45 = vadd.f32 1.0, %v2247_v44 }
 0x166   :  { %2248 = vrcp.f32 %v881_v45  ;;  %vm887_vm6 = vweird.f32 %v881_v45  ;;  %v893_v0 = vand.u32 2147483648, %v881_v45  ;;  %v891_v2 = vand.u32 2147483647, %v881_v45 }
 0x168   :  { %v894_v21 = vor.u32 1.1754944e-38, %v893_v0  ;;  %vm892_vm8 = vcmp.eq.f32.partialorder %v891_v2, 8.507059e+37 }
 0x16c   :  { %v2249_v46 = vpop.eup %2248 }
 0x16d   :  { %v883_v47 = vmul.f32 %v2249_v46, %v881_v45  ;;  %vm888_vm5 = vweird.f32 %v2249_v46 }
 0x16e   :  { %vm889_vm7 = vmor %vm887_vm6, %vm888_vm5 }
 0x16f   :  { %v884_v53 = vsub.f32 1.0, %v883_v47 }
 0x171   :  { %v885_v56 = vmul.f32 %v2249_v46, %v884_v53 }
 0x173   :  { %v886_v60 = vadd.f32 %v2249_v46, %v885_v56 }
 0x175   :  { %v890_v14 = vsel %vm889_vm7, %v2249_v46, %v886_v60 }
 0x176   :  { %v895_v32 = vsel %vm892_vm8, %v894_v21, %v890_v14 }
 0x177   :  { %v919_v42 = vmul.f32 %v895_v32, %v874_v24 }
 0x185   :  { %v596_v43 = vpop.permute.xlu2 %595 }
 0x186   :  { %618 = vst.msk [vmem:[#allocation3 + $0x8] sm:$0xff] %vm576_vm4, %v596_v43 }
 0x18d   :  { %v228_v34 = vpop.permute.xlu2 %227 }
 0x18e   :  { %v252_v5 = vmul.f32 %v2610_v27, %v228_v34 }
 0x190   :  { %v264_v29 = vadd.f32 %v2615_v28, %v252_v5 }
 0x192   :  { %v272_v43 = vmax.f32 %v264_v29, 0.0 }
 0x195   :  { %v594_v36 = vpop.permute.xlu1 %593 }
 0x196   :  { %617 = vst.msk [vmem:[#allocation3] sm:$0xff] %vm576_vm4, %v594_v36 }
 0x19d   :  { %v897_v49 = vld [vmem:[#allocation3] sm:$0xff]  ;;  %v628_v50 = vpop.permute.xlu0 %627 }
 0x19e   :  { %650 = vst.msk [vmem:[#allocation4 + $0x8] sm:$0xff] %vm576_vm4, %v628_v50  ;;  %v626_v51 = vpop.permute.xlu1 %625  ;;  %v898_v52 = vadd.f32 %v897_v49, %v850_v48 }
 0x19f   :  { %649 = vst.msk [vmem:[#allocation4] sm:$0xff] %vm576_vm4, %v626_v51 }
 0x1a0   :  { %v2161_v54 = vmul.f32 -1.442695, %v898_v52 }
 0x1a2   :  { %2250 = vpow2.f32 %v2161_v54 }
 0x1a5   :  { %v233_v39 = vpop.permute.xlu0 %232 }
 0x1a6   :  { %v223_v59 = vpop.permute.xlu1 %222  ;;  %v918_v40 = vld [vmem:[#allocation4] sm:$0xff]  ;;  %v253_v45 = vmul.f32 %v2610_v27, %v233_v39 }
 0x1a7   :  { %v251_v61 = vmul.f32 %v2610_v27, %v223_v59  ;;  %v920_v36 = vadd.f32 %v919_v42, %v918_v40 }
 0x1a8   :  { %v2251_v62 = vpop.eup %2250  ;;  %v265_v51 = vadd.f32 %v2615_v28, %v253_v45 }
 0x1a9   :  { %v263_v3 = vadd.f32 %v2615_v28, %v251_v61  ;;  %v902_v7 = vadd.f32 1.0, %v2251_v62 }
 0x1aa   :  { %v273_v59 = vmax.f32 %v265_v51, 0.0 }
 0x1ab   :  { %v271_v19 = vmax.f32 %v263_v3, 0.0  ;;  %2252 = vrcp.f32 %v902_v7  ;;  %v914_v48 = vand.u32 2147483648, %v902_v7  ;;  %v912_v50 = vand.u32 2147483647, %v902_v7 }
 0x1ac   :  { %2254 = vtanh.f32 %v920_v36  ;;  %vm908_vm10 = vweird.f32 %v902_v7  ;;  %v991_v36 = vld [vmem:[#allocation2 + $0x8] sm:$0xff] }
 0x1ad   :  { %2122 = vmatmul.msk.f32.gmra.mxu2 %vm358_vm3, %v271_v19  ;;  %v915_v54 = vor.u32 1.1754944e-38, %v914_v48  ;;  %vm913_vm12 = vcmp.eq.f32.partialorder %v912_v50, 8.507059e+37  ;;  %v598_v61 = vpop.permute.xlu0 %597 }
 0x1ae   :  { %v238_v46 = vpop.permute.xlu1 %237  ;;  %619 = vst.msk [vmem:[#allocation3 + $0x10] sm:$0xff] %vm576_vm4, %v598_v61 }
 0x1af   :  { %v254_v53 = vmul.f32 %v2610_v27, %v238_v46 }
 0x1b1   :  { %v2253_v41 = vpop.eup %2252  ;;  %v266_v2 = vadd.f32 %v2615_v28, %v254_v53  ;;  %v1013_v53 = vld [vmem:[#allocation3 + $0x8] sm:$0xff] }
 0x1b2   :  { %v904_v44 = vmul.f32 %v2253_v41, %v902_v7  ;;  %vm909_vm9 = vweird.f32 %v2253_v41  ;;  %v2255_v0 = vpop.eup %2254  ;;  %v243_v7 = vpop.permute.xlu2 %242 }
 0x1b3   :  { %vm910_vm11 = vmor %vm908_vm10, %vm909_vm9  ;;  %v274_v14 = vmax.f32 %v266_v2, 0.0  ;;  %v255_v19 = vmul.f32 %v2610_v27, %v243_v7  ;;  %v474_v27 = vpop.f32.mrf.mxu3 }
 0x1b4   :  { %v905_v47 = vsub.f32 1.0, %v904_v44 }
 0x1b5   :  { %2123 = vmatmul.msk.f32.gmra.mxu2 %vm358_vm3, %v272_v43  ;;  %v267_v21 = vadd.f32 %v2615_v28, %v255_v19 }
 0x1b6   :  { %v906_v49 = vmul.f32 %v2253_v41, %v905_v47  ;;  %v630_v62 = vpop.permute.xlu1 %629 }
 0x1b7   :  { %651 = vst.msk [vmem:[#allocation4 + $0x10] sm:$0xff] %vm576_vm4, %v630_v62  ;;  %v275_v24 = vmax.f32 %v267_v21, 0.0 }
 0x1b8   :  { %v907_v52 = vadd.f32 %v2253_v41, %v906_v49 }
 0x1ba   :  { %v911_v56 = vsel %vm910_vm11, %v2253_v41, %v907_v52 }
 0x1bb   :  { %v916_v34 = vsel %vm913_vm12, %v915_v54, %v911_v56  ;;  %v477_v32 = vpop.f32.mrf.mxu3 }
 0x1bc   :  { %v922_v60 = vsub.f32 1.0, %v916_v34  ;;  %v924_v5 = vmul.f32 0.0, %v916_v34 }
 0x1bd   :  { %2124 = vmatmul.msk.f32.gmra.mxu2 %vm358_vm3, %v273_v59 }
 0x1be   :  { %v923_v3 = vmul.f32 %v2255_v0, %v922_v60 }
 0x1c0   :  { %v2821_v13 = vadd.f32 %v924_v5, %v923_v3 }
 0x1c2   :  { %926 = vst.msk [vmem:[#allocation5] sm:$0xff] %vm576_vm4, %v2821_v13  ;;  %2162 = vmatmul.msk.f32.vlgmr.msrb.gmra.mxu1 %vm576_vm4, %v2821_v13 }
 0x1c3   :  { %982 = vmatpush.msrb.mxu1 %v2691_v15  ;;  %v480_v44 = vpop.f32.mrf.mxu3 }
 0x1c5   :  { %2125 = vmatmul.msk.f32.gmra.mxu2 %vm358_vm3, %v274_v14  ;;  %983 = vmatpush.msrb.mxu1 %v2703_v23 }
 0x1c7   :  { %984 = vmatpush.msrb.mxu1 %v2716_v26 }
 0x1c9   :  { %985 = vmatpush.msrb.mxu1 %v2725_v31 }
 0x1ca   :  { %2163 = vmatmul.msk.f32.vlgmr.msra.gmra.mxu1 %vm576_vm4, %v2821_v13 }
 0x1cb   :  { %1060 = vmatpush.msra.mxu1 %v2648_v57  ;;  %v483_v51 = vpop.f32.mrf.mxu3 }
 0x1cd   :  { %2126 = vmatmul.msk.f32.gmra.mxu2 %vm358_vm3, %v275_v24  ;;  %1061 = vmatpush.msra.mxu1 %v2653_v58 }
 0x1cf   :  { %1062 = vmatpush.msra.mxu1 %v2661_v63 }
 0x1d1   :  { %1063 = vmatpush.msra.mxu1 %v2669_v4 }
 0x1d2   :  { %2164 = vmatmul.msk.f32.vlgmr.msrb.gmra.mxu1 %vm576_vm4, %v2821_v13 }
 0x1d3   :  { %1080 = vmatpush.msrb.mxu1 %v2679_v8  ;;  %v486_v0 = vpop.f32.mrf.mxu3 }
 0x1d5   :  { %1081 = vmatpush.msrb.mxu1 %v2684_v12 }
 0x1d7   :  { %1082 = vmatpush.msrb.mxu1 %v2696_v17 }
 0x1d9   :  { %1083 = vmatpush.msrb.mxu1 %v2709_v25 }
 0x230   :  { %v409_v28 = vpop.f32.mrf.mxu2 }
 0x231   :  { %v475_v29 = vadd.f32 %v474_v27, %v409_v28 }
 0x233   :  { %v559_v39 = vadd.f32 %v2784_v30, %v475_v29 }
 0x235   :  { %v571_v40 = vadd.f32 %v2759_v55, %v559_v39 }
 0x237   :  { %631 = vrot.lane.b32.xlu0 %v571_v40, %s2342_s11  ;;  %580 = vst.msk [vmem:[#allocation2 + $0x18] sm:$0xff] %vm576_vm4, %v571_v40  ;;  %599 = vrot.lane.b32.xlu2 %v571_v40, %s2341_s6 }
 0x238   :  { %v412_v41 = vpop.f32.mrf.mxu2 }
 0x239   :  { %v478_v42 = vadd.f32 %v477_v32, %v412_v41 }
 0x23b   :  { %v560_v43 = vadd.f32 %v2790_v33, %v478_v42 }
 0x23d   :  { %v572_v45 = vadd.f32 %v2759_v55, %v560_v43 }
 0x23f   :  { %633 = vrot.lane.b32.xlu2 %v572_v45, %s2342_s11  ;;  %581 = vst.msk [vmem:[#allocation2 + $0x20] sm:$0xff] %vm576_vm4, %v572_v45  ;;  %601 = vrot.lane.b32.xlu1 %v572_v45, %s2341_s6  ;;  %v947_v30 = vpop.f32.mrf.mxu1 }
 0x240   :  { %v415_v46 = vpop.f32.mrf.mxu2  ;;  %v992_v47 = vadd.f32 %v991_v36, %v947_v30  ;;  %v1035_v36 = vld [vmem:[#allocation4 + $0x8] sm:$0xff] }
 0x241   :  { %v481_v48 = vadd.f32 %v480_v44, %v415_v46 }
 0x242   :  { %v2165_v49 = vmul.f32 -1.442695, %v992_v47 }
 0x243   :  { %v561_v50 = vadd.f32 %v2792_v35, %v481_v48 }
 0x244   :  { %2256 = vpow2.f32 %v2165_v49 }
 0x245   :  { %v573_v33 = vadd.f32 %v2759_v55, %v561_v50 }
 0x247   :  { %635 = vrot.lane.b32.xlu1 %v573_v33, %s2342_s11  ;;  %582 = vst.msk [vmem:[#allocation2 + $0x28] sm:$0xff] %vm576_vm4, %v573_v33  ;;  %603 = vrot.lane.b32.xlu0 %v573_v33, %s2341_s6  ;;  %v967_v52 = vpop.f32.mrf.mxu1 }
 0x248   :  { %v418_v54 = vpop.f32.mrf.mxu2  ;;  %v1014_v56 = vadd.f32 %v1013_v53, %v967_v52 }
 0x249   :  { %v484_v59 = vadd.f32 %v483_v51, %v418_v54 }
 0x24a   :  { %v2257_v34 = vpop.eup %2256  ;;  %v2166_v60 = vmul.f32 -1.442695, %v1014_v56 }
 0x24b   :  { %v996_v61 = vadd.f32 1.0, %v2257_v34  ;;  %v562_v35 = vadd.f32 %v2794_v37, %v484_v59  ;;  %v658_v34 = vld [vmem:[%s3288_s18 + $0x8] sm:$0xff] }
 0x24c   :  { %2258 = vpow2.f32 %v2166_v60  ;;  %742 = vmatpush.msrb.mxu3 %v658_v34 }
 0x24d   :  { %2260 = vrcp.f32 %v996_v61  ;;  %v574_v62 = vadd.f32 %v2759_v55, %v562_v35  ;;  %v1008_v27 = vand.u32 2147483648, %v996_v61  ;;  %v1006_v29 = vand.u32 2147483647, %v996_v61  ;;  %v657_v35 = vld [vmem:[%s3288_s18] sm:$0xff] }
 0x24e   :  { %vm1002_vm14 = vweird.f32 %v996_v61  ;;  %743 = vmatpush.msrb.mxu3 %v657_v35 }
 0x24f   :  { %637 = vrot.lane.b32.xlu0 %v574_v62, %s2342_s11  ;;  %583 = vst.msk [vmem:[#allocation2 + $0x30] sm:$0xff] %vm576_vm4, %v574_v62  ;;  %605 = vrot.lane.b32.xlu2 %v574_v62, %s2341_s6  ;;  %v987_v32 = vpop.f32.mrf.mxu1  ;;  %vm1007_vm3 = vcmp.eq.f32.partialorder %v1006_v29, 8.507059e+37  ;;  %v1131_v29 = vld [vmem:[#allocation3 + $0x10] sm:$0xff] }
 0x250   :  { %v421_v2 = vpop.f32.mrf.mxu2  ;;  %v988_v42 = vadd.f32 %v2806_v1, %v987_v32  ;;  %2152 = vmatmul.msk.f32.vlgmr.msrb.gmra.mxu3 %vm282_vm2, %v2507_v6 }
 0x251   :  { %v487_v3 = vadd.f32 %v486_v0, %v421_v2  ;;  %1198 = vmatpush.msra.mxu3 %v2679_v8  ;;  %v113_v2 = vld [vmem:[%s3289_s3] sm:$0xff] }
 0x252   :  { %v2259_v5 = vpop.eup %2258 }
 0x253   :  { %v2261_v7 = vpop.eup %2260  ;;  %v1018_v14 = vadd.f32 1.0, %v2259_v5  ;;  %v563_v19 = vadd.f32 %v2796_v38, %v487_v3  ;;  %v1009_v38 = vor.u32 1.1754944e-38, %v1008_v27  ;;  %1199 = vmatpush.msra.mxu3 %v2684_v12  ;;  %v114_v3 = vld [vmem:[%s3289_s3 + $0x8] sm:$0xff] }
 0x254   :  { %v998_v21 = vmul.f32 %v2261_v7, %v996_v61  ;;  %vm1003_vm13 = vweird.f32 %v2261_v7 }
 0x255   :  { %2262 = vrcp.f32 %v1018_v14  ;;  %v575_v24 = vadd.f32 %v2759_v55, %v563_v19  ;;  %vm1004_vm15 = vmor %vm1002_vm14, %vm1003_vm13  ;;  %v1030_v30 = vand.u32 2147483648, %v1018_v14  ;;  %v1028_v47 = vand.u32 2147483647, %v1018_v14  ;;  %1200 = vmatpush.msra.mxu3 %v2696_v17 }
 0x256   :  { %v999_v37 = vsub.f32 1.0, %v998_v21  ;;  %vm1024_vm6 = vweird.f32 %v1018_v14  ;;  %v116_v21 = vld [vmem:[%s3289_s3 + $0x18] sm:$0xff] }
 0x257   :  { %639 = vrot.lane.b32.xlu2 %v575_v24, %s2342_s11  ;;  %584 = vst.msk [vmem:[#allocation2 + $0x38] sm:$0xff] %vm576_vm4, %v575_v24  ;;  %607 = vrot.lane.b32.xlu1 %v575_v24, %s2341_s6  ;;  %v1031_v50 = vor.u32 1.1754944e-38, %v1030_v30  ;;  %vm1029_vm8 = vcmp.eq.f32.partialorder %v1028_v47, 8.507059e+37 }
 0x258   :  { %v1000_v28 = vmul.f32 %v2261_v7, %v999_v37  ;;  %1201 = vmatpush.msra.mxu3 %v2709_v25  ;;  %v1109_v37 = vld [vmem:[#allocation2 + $0x10] sm:$0xff] }
 0x259   :  { %2153 = vmatmul.msk.f32.gmra.mxu3 %vm282_vm2, %v2521_v9 }
 0x25a   :  { %v1001_v39 = vadd.f32 %v2261_v7, %v1000_v28  ;;  %1336 = vmatpush.msrb.mxu3 %v2691_v15 }
 0x25b   :  { %v2263_v40 = vpop.eup %2262 }
 0x25c   :  { %v1020_v41 = vmul.f32 %v2263_v40, %v1018_v14  ;;  %v1005_v55 = vsel %vm1004_vm15, %v2261_v7, %v1001_v39  ;;  %vm1025_vm5 = vweird.f32 %v2263_v40  ;;  %1337 = vmatpush.msrb.mxu3 %v2703_v23  ;;  %v115_v14 = vld [vmem:[%s3289_s3 + $0x10] sm:$0xff] }
 0x25d   :  { %v1010_v43 = vsel %vm1007_vm3, %v1009_v38, %v1005_v55  ;;  %vm1026_vm7 = vmor %vm1024_vm6, %vm1025_vm5 }
 0x25e   :  { %v1021_v44 = vsub.f32 1.0, %v1020_v41  ;;  %v1036_v45 = vmul.f32 %v1010_v43, %v988_v42  ;;  %1338 = vmatpush.msrb.mxu3 %v2716_v26 }
 0x260   :  { %v1022_v46 = vmul.f32 %v2263_v40, %v1021_v44  ;;  %v1037_v48 = vadd.f32 %v1036_v45, %v1035_v36  ;;  %1339 = vmatpush.msrb.mxu3 %v2725_v31 }
 0x261   :  { %2154 = vmatmul.msk.f32.gmra.mxu3 %vm282_vm2, %v2529_v10 }
 0x262   :  { %v1023_v49 = vadd.f32 %v2263_v40, %v1022_v46  ;;  %2264 = vtanh.f32 %v1037_v48 }
 0x264   :  { %v1027_v33 = vsel %vm1026_vm7, %v2263_v40, %v1023_v49 }
 0x265   :  { %v1032_v51 = vsel %vm1029_vm8, %v1031_v50, %v1027_v33 }
 0x266   :  { %v1039_v52 = vsub.f32 1.0, %v1032_v51  ;;  %v1041_v56 = vmul.f32 %v1032_v51, %v2821_v13  ;;  %v659_v13 = vld [vmem:[%s3287_s19] sm:$0xf] }
 0x267   :  { %2143 = vmatpush.msk.msrb.mxu2 %vm151_vm0, %v659_v13 }
 0x268   :  { %v2265_v53 = vpop.eup %2264  ;;  %2144 = vmatmul.msk.f32.vlgmr.msrb.gmra.mxu2 %vm126_vm1, %v113_v2 }
 0x269   :  { %v1040_v54 = vmul.f32 %v2265_v53, %v1039_v52  ;;  %1178 = vmatpush.msra.mxu2 %v2648_v57  ;;  %2155 = vmatmul.msk.f32.gmra.mxu3 %vm282_vm2, %v2536_v11  ;;  %v117_v11 = vld [vmem:[%s3289_s3 + $0x20] sm:$0xff] }
 0x26b   :  { %v2874_v59 = vadd.f32 %v1041_v56, %v1040_v54  ;;  %1179 = vmatpush.msra.mxu2 %v2653_v58  ;;  %v1153_v56 = vld [vmem:[#allocation4 + $0x10] sm:$0xff] }
 0x26d   :  { %1044 = vst.msk [vmem:[#allocation5 + $0x8] sm:$0xff] %vm576_vm4, %v2874_v59  ;;  %2167 = vmatmul.msk.f32.vlgmr.msra.gmra.mxu1 %vm576_vm4, %v2874_v59  ;;  %2169 = vmatmul.msk.f32.vlgmr.msrb.gmra.mxu0 %vm576_vm4, %v2874_v59 }
 0x26e   :  { %1218 = vmatpush.msra.mxu1 %v2691_v15  ;;  %1434 = vmatpush.msrb.mxu0 %v2679_v8 }
 0x26f   :  { %1180 = vmatpush.msra.mxu2 %v2661_v63 }
 0x270   :  { %1219 = vmatpush.msra.mxu1 %v2703_v23  ;;  %1435 = vmatpush.msrb.mxu0 %v2684_v12 }
 0x271   :  { %1181 = vmatpush.msra.mxu2 %v2669_v4  ;;  %2156 = vmatmul.msk.f32.gmra.mxu3 %vm282_vm2, %v2556_v16  ;;  %v118_v16 = vld [vmem:[%s3289_s3 + $0x28] sm:$0xff] }
 0x272   :  { %1220 = vmatpush.msra.mxu1 %v2716_v26  ;;  %1436 = vmatpush.msrb.mxu0 %v2696_v17 }
 0x273   :  { %1316 = vmatpush.msrb.mxu2 %v2679_v8 }
 0x274   :  { %1221 = vmatpush.msra.mxu1 %v2725_v31  ;;  %1437 = vmatpush.msrb.mxu0 %v2709_v25 }
 0x275   :  { %2168 = vmatmul.msk.f32.vlgmr.msrb.gmra.mxu1 %vm576_vm4, %v2874_v59  ;;  %1317 = vmatpush.msrb.mxu2 %v2684_v12 }
 0x276   :  { %1414 = vmatpush.msrb.mxu1 %v2648_v57  ;;  %2145 = vmatmul.msk.f32.gmra.mxu2 %vm126_vm1, %v114_v3 }
 0x277   :  { %1318 = vmatpush.msrb.mxu2 %v2696_v17 }
 0x278   :  { %1415 = vmatpush.msrb.mxu1 %v2653_v58 }
 0x279   :  { %1319 = vmatpush.msrb.mxu2 %v2709_v25  ;;  %2157 = vmatmul.msk.f32.gmra.mxu3 %vm282_vm2, %v2567_v18  ;;  %v119_v18 = vld [vmem:[%s3289_s3 + $0x30] sm:$0xff] }
 0x27a   :  { %1416 = vmatpush.msrb.mxu1 %v2661_v63 }
 0x27c   :  { %1417 = vmatpush.msrb.mxu1 %v2669_v4 }
 0x27e   :  { %2146 = vmatmul.msk.f32.gmra.mxu2 %vm126_vm1, %v115_v14 }
 0x281   :  { %2158 = vmatmul.msk.f32.gmra.mxu3 %vm282_vm2, %v2578_v20 }
 0x286   :  { %2147 = vmatmul.msk.f32.gmra.mxu2 %vm126_vm1, %v116_v21 }
 0x289   :  { %2159 = vmatmul.msk.f32.gmra.mxu3 %vm282_vm2, %v2589_v22  ;;  %v120_v22 = vld [vmem:[%s3289_s3 + $0x38] sm:$0xff] }
 0x28e   :  { %2148 = vmatmul.msk.f32.gmra.mxu2 %vm126_vm1, %v117_v11 }
 0x291   :  { %v600_v60 = vpop.permute.xlu2 %599 }
 0x292   :  { %620 = vst.msk [vmem:[#allocation3 + $0x18] sm:$0xff] %vm576_vm4, %v600_v60 }
 0x296   :  { %2149 = vmatmul.msk.f32.gmra.mxu2 %vm126_vm1, %v118_v16 }
 0x299   :  { %v634_v61 = vpop.permute.xlu2 %633 }
 0x29a   :  { %653 = vst.msk [vmem:[#allocation4 + $0x20] sm:$0xff] %vm576_vm4, %v634_v61 }
 0x29e   :  { %2150 = vmatmul.msk.f32.gmra.mxu2 %vm126_vm1, %v119_v18 }
 0x2a6   :  { %2151 = vmatmul.msk.f32.gmra.mxu2 %vm126_vm1, %v120_v22 }
 0x2a9   :  { %v632_v62 = vpop.permute.xlu0 %631  ;;  %v606_v0 = vpop.permute.xlu2 %605 }
 0x2aa   :  { %652 = vst.msk [vmem:[#allocation4 + $0x18] sm:$0xff] %vm576_vm4, %v632_v62 }
 0x2ab   :  { %623 = vst.msk [vmem:[#allocation3 + $0x30] sm:$0xff] %vm576_vm4, %v606_v0 }
 0x2b1   :  { %v602_v6 = vpop.permute.xlu1 %601  ;;  %v640_v5 = vpop.permute.xlu2 %639 }
 0x2b2   :  { %621 = vst.msk [vmem:[#allocation3 + $0x20] sm:$0xff] %vm576_vm4, %v602_v6 }
 0x2b3   :  { %656 = vst.msk [vmem:[#allocation4 + $0x38] sm:$0xff] %vm576_vm4, %v640_v5 }
 0x2b9   :  { %v604_v9 = vpop.permute.xlu0 %603  ;;  %v636_v7 = vpop.permute.xlu1 %635 }
 0x2ba   :  { %622 = vst.msk [vmem:[#allocation3 + $0x28] sm:$0xff] %vm576_vm4, %v604_v9 }
 0x2bb   :  { %654 = vst.msk [vmem:[#allocation4 + $0x28] sm:$0xff] %vm576_vm4, %v636_v7 }
 0x2c1   :  { %v638_v19 = vpop.permute.xlu0 %637 }
 0x2c2   :  { %655 = vst.msk [vmem:[#allocation4 + $0x30] sm:$0xff] %vm576_vm4, %v638_v19 }
 0x2c9   :  { %v608_v10 = vpop.permute.xlu1 %607 }
 0x2ca   :  { %624 = vst.msk [vmem:[#allocation3 + $0x38] sm:$0xff] %vm576_vm4, %v608_v10 }
 0x2ea   :  { %v1065_v20 = vpop.f32.mrf.mxu1  ;;  %v1105_v46 = vpop.f32.mrf.mxu0 }
 0x2eb   :  { %v1110_v24 = vadd.f32 %v1109_v37, %v1065_v20  ;;  %v1106_v50 = vadd.f32 %v2806_v1, %v1105_v46 }
 0x2ed   :  { %v2170_v27 = vmul.f32 -1.442695, %v1110_v24 }
 0x2ef   :  { %2266 = vpow2.f32 %v2170_v27 }
 0x2f2   :  { %v1085_v28 = vpop.f32.mrf.mxu1 }
 0x2f3   :  { %v1132_v32 = vadd.f32 %v1131_v29, %v1085_v28 }
 0x2f5   :  { %v2267_v39 = vpop.eup %2266  ;;  %v2171_v40 = vmul.f32 -1.442695, %v1132_v32 }
 0x2f6   :  { %v1114_v38 = vadd.f32 1.0, %v2267_v39 }
 0x2f7   :  { %2268 = vpow2.f32 %v2171_v40 }
 0x2f8   :  { %2270 = vrcp.f32 %v1114_v38  ;;  %v1126_v45 = vand.u32 2147483648, %v1114_v38  ;;  %v1124_v36 = vand.u32 2147483647, %v1114_v38  ;;  %vm1120_vm2 = vweird.f32 %v1114_v38 }
 0x2fa   :  { %v1127_v49 = vor.u32 1.1754944e-38, %v1126_v45  ;;  %vm1125_vm9 = vcmp.eq.f32.partialorder %v1124_v36, 8.507059e+37 }
 0x2fd   :  { %v2269_v41 = vpop.eup %2268 }
 0x2fe   :  { %v2271_v42 = vpop.eup %2270  ;;  %v1136_v55 = vadd.f32 1.0, %v2269_v41 }
 0x2ff   :  { %v1116_v43 = vmul.f32 %v2271_v42, %v1114_v38  ;;  %vm1121_vm0 = vweird.f32 %v2271_v42 }
 0x300   :  { %2272 = vrcp.f32 %v1136_v55  ;;  %vm1122_vm1 = vmor %vm1120_vm2, %vm1121_vm0  ;;  %v1148_v13 = vand.u32 2147483648, %v1136_v55  ;;  %v1146_v61 = vand.u32 2147483647, %v1136_v55  ;;  %vm1142_vm11 = vweird.f32 %v1136_v55 }
 0x301   :  { %v1117_v44 = vsub.f32 1.0, %v1116_v43 }
 0x302   :  { %v1149_v62 = vor.u32 1.1754944e-38, %v1148_v13  ;;  %vm1147_vm13 = vcmp.eq.f32.partialorder %v1146_v61, 8.507059e+37 }
 0x303   :  { %v1118_v30 = vmul.f32 %v2271_v42, %v1117_v44 }
 0x305   :  { %v1119_v47 = vadd.f32 %v2271_v42, %v1118_v30 }
 0x306   :  { %v2273_v48 = vpop.eup %2272 }
 0x307   :  { %v1123_v33 = vsel %vm1122_vm1, %v2271_v42, %v1119_v47  ;;  %v1138_v51 = vmul.f32 %v2273_v48, %v1136_v55  ;;  %vm1143_vm10 = vweird.f32 %v2273_v48 }
 0x308   :  { %v1128_v52 = vsel %vm1125_vm9, %v1127_v49, %v1123_v33  ;;  %vm1144_vm12 = vmor %vm1142_vm11, %vm1143_vm10  ;;  %v1227_v49 = vld [vmem:[#allocation2 + $0x18] sm:$0xff] }
 0x309   :  { %v1154_v53 = vmul.f32 %v1128_v52, %v1106_v50  ;;  %v1139_v54 = vsub.f32 1.0, %v1138_v51  ;;  %v1249_v33 = vld [vmem:[#allocation3 + $0x18] sm:$0xff] }
 0x30b   :  { %v1155_v34 = vadd.f32 %v1154_v53, %v1153_v56  ;;  %v1140_v60 = vmul.f32 %v2273_v48, %v1139_v54 }
 0x30d   :  { %2274 = vtanh.f32 %v1155_v34  ;;  %v1141_v35 = vadd.f32 %v2273_v48, %v1140_v60 }
 0x30f   :  { %v1145_v0 = vsel %vm1144_vm12, %v2273_v48, %v1141_v35 }
 0x310   :  { %v1150_v2 = vsel %vm1147_vm13, %v1149_v62, %v1145_v0 }
 0x311   :  { %v1157_v6 = vsub.f32 1.0, %v1150_v2  ;;  %v1159_v9 = vmul.f32 %v1150_v2, %v2874_v59 }
 0x313   :  { %v2275_v3 = vpop.eup %2274 }
 0x314   :  { %v1158_v5 = vmul.f32 %v2275_v3, %v1157_v6 }
 0x316   :  { %v2982_v7 = vadd.f32 %v1159_v9, %v1158_v5 }
 0x318   :  { %1162 = vst.msk [vmem:[#allocation5 + $0x10] sm:$0xff] %vm576_vm4, %v2982_v7  ;;  %2172 = vmatmul.msk.f32.vlgmr.msra.gmra.mxu2 %vm576_vm4, %v2982_v7  ;;  %2173 = vmatmul.msk.f32.vlgmr.msra.gmra.mxu3 %vm576_vm4, %v2982_v7 }
 0x319   :  { %2174 = vmatmul.msk.f32.vlgmr.msra.gmra.mxu1 %vm576_vm4, %v2982_v7  ;;  %1454 = vmatpush.msra.mxu2 %v2691_v15 }
 0x31a   :  { %1532 = vmatpush.msra.mxu3 %v2648_v57  ;;  %1552 = vmatpush.msra.mxu1 %v2679_v8  ;;  %v745_v57 = vpop.f32.mrf.mxu3  ;;  %v2242_v8 = vld [vmem:[%s3290_s20] ss:$0 sm:$0xff] }
 0x31b   :  { %1455 = vmatpush.msra.mxu2 %v2703_v23 }
 0x31c   :  { %1533 = vmatpush.msra.mxu3 %v2653_v58  ;;  %1553 = vmatpush.msra.mxu1 %v2684_v12  ;;  %v704_v58 = vpop.f32.mrf.mxu2 }
 0x31d   :  { %1456 = vmatpush.msra.mxu2 %v2716_v26  ;;  %v746_v15 = vadd.f32 %v745_v57, %v704_v58 }
 0x31e   :  { %1534 = vmatpush.msra.mxu3 %v2661_v63  ;;  %1554 = vmatpush.msra.mxu1 %v2696_v17 }
 0x31f   :  { %1457 = vmatpush.msra.mxu2 %v2725_v31  ;;  %v773_v12 = vadd.f32 %v2242_v8, %v746_v15 }
 0x320   :  { %1535 = vmatpush.msra.mxu3 %v2669_v4  ;;  %1555 = vmatpush.msra.mxu1 %v2709_v25 }
 0x321   :  { %v781_v26 = vmax.f32 %v773_v12, 0.0 }
 0x322   :  { %v748_v23 = vpop.f32.mrf.mxu3 }
 0x323   :  { %789 = vst.msk [vmem:[#allocation6] sm:$0xff] %vm576_vm4, %v781_v26 }
 0x324   :  { %v707_v63 = vpop.f32.mrf.mxu2 }
 0x325   :  { %v749_v17 = vadd.f32 %v748_v23, %v707_v63 }
 0x327   :  { %v774_v59 = vadd.f32 %v2242_v8, %v749_v17 }
 0x329   :  { %v782_v31 = vmax.f32 %v774_v59, 0.0 }
 0x32a   :  { %v751_v14 = vpop.f32.mrf.mxu3 }
 0x32b   :  { %790 = vst.msk [vmem:[#allocation6 + $0x8] sm:$0xff] %vm576_vm4, %v782_v31 }
 0x32c   :  { %v710_v4 = vpop.f32.mrf.mxu2 }
 0x32d   :  { %v752_v25 = vadd.f32 %v751_v14, %v710_v4  ;;  %v1271_v14 = vld [vmem:[#allocation4 + $0x18] sm:$0xff] }
 0x32f   :  { %v775_v19 = vadd.f32 %v2242_v8, %v752_v25 }
 0x331   :  { %v783_v10 = vmax.f32 %v775_v19, 0.0 }
 0x332   :  { %v754_v21 = vpop.f32.mrf.mxu3 }
 0x333   :  { %791 = vst.msk [vmem:[#allocation6 + $0x10] sm:$0xff] %vm576_vm4, %v783_v10 }
 0x334   :  { %v713_v11 = vpop.f32.mrf.mxu2 }
 0x335   :  { %v755_v18 = vadd.f32 %v754_v21, %v713_v11 }
 0x337   :  { %v776_v20 = vadd.f32 %v2242_v8, %v755_v18 }
 0x339   :  { %v784_v37 = vmax.f32 %v776_v20, 0.0 }
 0x33a   :  { %v757_v16 = vpop.f32.mrf.mxu3 }
 0x33b   :  { %792 = vst.msk [vmem:[#allocation6 + $0x18] sm:$0xff] %vm576_vm4, %v784_v37  ;;  %v3030_v37 = vld [vmem:[%s3285_s16 + $0x18] sm:$0xff] }
 0x33c   :  { %v716_v24 = vpop.f32.mrf.mxu2 }
 0x33d   :  { %v758_v27 = vadd.f32 %v757_v16, %v716_v24  ;;  %v2328_v24 = vld [vmem:[%s3284_s15 + $0x18] sm:$0xff] }
 0x33f   :  { %v777_v28 = vadd.f32 %v2242_v8, %v758_v27  ;;  %v3042_v27 = vld [vmem:[%s3285_s16 + $0x10] sm:$0xff] }
 0x341   :  { %v785_v29 = vmax.f32 %v777_v28, 0.0  ;;  %v2331_v28 = vld [vmem:[%s3284_s15 + $0x10] sm:$0xff] }
 0x342   :  { %v760_v22 = vpop.f32.mrf.mxu3 }
 0x343   :  { %793 = vst.msk [vmem:[#allocation6 + $0x20] sm:$0xff] %vm576_vm4, %v785_v29  ;;  %v3054_v29 = vld [vmem:[%s3285_s16 + $0x8] sm:$0xff] }
 0x344   :  { %v719_v32 = vpop.f32.mrf.mxu2 }
 0x345   :  { %v761_v39 = vadd.f32 %v760_v22, %v719_v32  ;;  %v2330_v22 = vld [vmem:[%s3283_s14 + $0x10] sm:$0xff]  ;;  %v2333_v32 = vld [vmem:[%s3283_s14 + $0x8] sm:$0xff] }
 0x347   :  { %v778_v40 = vadd.f32 %v2242_v8, %v761_v39  ;;  %v2334_v39 = vld [vmem:[%s3284_s15 + $0x8] sm:$0xff] }
 0x349   :  { %v786_v41 = vmax.f32 %v778_v40, 0.0  ;;  %v3066_v40 = vld [vmem:[%s3285_s16] sm:$0xff] }
 0x34a   :  { %v763_v38 = vpop.f32.mrf.mxu3 }
 0x34b   :  { %794 = vst.msk [vmem:[#allocation6 + $0x28] sm:$0xff] %vm576_vm4, %v786_v41  ;;  %v2337_v41 = vld [vmem:[%s3284_s15] sm:$0xff] }
 0x34c   :  { %v722_v42 = vpop.f32.mrf.mxu2 }
 0x34d   :  { %v764_v55 = vadd.f32 %v763_v38, %v722_v42  ;;  %v2336_v38 = vld [vmem:[%s3283_s14] sm:$0xff] }
 0x34f   :  { %v779_v43 = vadd.f32 %v2242_v8, %v764_v55  ;;  %v1345_v55 = vld [vmem:[#allocation2 + $0x20] sm:$0xff] }
 0x351   :  { %v787_v44 = vmax.f32 %v779_v43, 0.0 }
 0x352   :  { %v766_v45 = vpop.f32.mrf.mxu3 }
 0x353   :  { %795 = vst.msk [vmem:[#allocation6 + $0x30] sm:$0xff] %vm576_vm4, %v787_v44 }
 0x354   :  { %v725_v30 = vpop.f32.mrf.mxu2 }
 0x355   :  { %v767_v36 = vadd.f32 %v766_v45, %v725_v30  ;;  %v1367_v30 = vld [vmem:[#allocation3 + $0x20] sm:$0xff] }
 0x357   :  { %v780_v46 = vadd.f32 %v2242_v8, %v767_v36 }
 0x359   :  { %v788_v47 = vmax.f32 %v780_v46, 0.0 }
 0x35b   :  { %796 = vst.msk [vmem:[#allocation6 + $0x38] sm:$0xff] %vm576_vm4, %v788_v47 }
 0x396   :  { %v1223_v57 = vpop.f32.mrf.mxu1 }
 0x397   :  { %v1224_v12 = vadd.f32 %v2806_v1, %v1223_v57 }
 0x39b   :  { %v1183_v48 = vpop.f32.mrf.mxu2  ;;  %v1203_v50 = vpop.f32.mrf.mxu3 }
 0x39c   :  { %v1228_v51 = vadd.f32 %v1227_v49, %v1183_v48  ;;  %v1250_v52 = vadd.f32 %v1249_v33, %v1203_v50 }
 0x39e   :  { %v2175_v53 = vmul.f32 -1.442695, %v1228_v51  ;;  %v2176_v54 = vmul.f32 -1.442695, %v1250_v52 }
 0x3a0   :  { %2276 = vpow2.f32 %v2175_v53 }
 0x3a1   :  { %2278 = vpow2.f32 %v2176_v54 }
 0x3a6   :  { %v2277_v56 = vpop.eup %2276 }
 0x3a7   :  { %v2279_v13 = vpop.eup %2278  ;;  %v1232_v34 = vadd.f32 1.0, %v2277_v56 }
 0x3a8   :  { %v1254_v60 = vadd.f32 1.0, %v2279_v13 }
 0x3a9   :  { %2280 = vrcp.f32 %v1232_v34  ;;  %v1244_v6 = vand.u32 2147483648, %v1232_v34  ;;  %v1242_v9 = vand.u32 2147483647, %v1232_v34  ;;  %vm1238_vm15 = vweird.f32 %v1232_v34 }
 0x3aa   :  { %2282 = vrcp.f32 %v1254_v60  ;;  %v1266_v59 = vand.u32 2147483648, %v1254_v60  ;;  %vm1260_vm7 = vweird.f32 %v1254_v60  ;;  %v1264_v31 = vand.u32 2147483647, %v1254_v60 }
 0x3ab   :  { %v1245_v15 = vor.u32 1.1754944e-38, %v1244_v6  ;;  %vm1243_vm5 = vcmp.eq.f32.partialorder %v1242_v9, 8.507059e+37 }
 0x3ac   :  { %v1267_v19 = vor.u32 1.1754944e-38, %v1266_v59  ;;  %vm1265_vm0 = vcmp.eq.f32.partialorder %v1264_v31, 8.507059e+37 }
 0x3af   :  { %v2281_v61 = vpop.eup %2280 }
 0x3b0   :  { %v2283_v35 = vpop.eup %2282  ;;  %v1234_v62 = vmul.f32 %v2281_v61, %v1232_v34  ;;  %vm1239_vm14 = vweird.f32 %v2281_v61 }
 0x3b1   :  { %v1256_v0 = vmul.f32 %v2283_v35, %v1254_v60  ;;  %vm1240_vm3 = vmor %vm1238_vm15, %vm1239_vm14  ;;  %vm1261_vm6 = vweird.f32 %v2283_v35 }
 0x3b2   :  { %v1235_v2 = vsub.f32 1.0, %v1234_v62  ;;  %vm1262_vm8 = vmor %vm1260_vm7, %vm1261_vm6 }
 0x3b3   :  { %v1257_v3 = vsub.f32 1.0, %v1256_v0 }
 0x3b4   :  { %v1236_v5 = vmul.f32 %v2281_v61, %v1235_v2 }
 0x3b5   :  { %v1258_v8 = vmul.f32 %v2283_v35, %v1257_v3 }
 0x3b6   :  { %v1237_v58 = vadd.f32 %v2281_v61, %v1236_v5 }
 0x3b7   :  { %v1259_v63 = vadd.f32 %v2283_v35, %v1258_v8  ;;  %v1389_v8 = vld [vmem:[#allocation4 + $0x20] sm:$0xff] }
 0x3b8   :  { %v1241_v23 = vsel %vm1240_vm3, %v2281_v61, %v1237_v58 }
 0x3b9   :  { %v1246_v26 = vsel %vm1243_vm5, %v1245_v15, %v1241_v23  ;;  %v1263_v25 = vsel %vm1262_vm8, %v2283_v35, %v1259_v63 }
 0x3ba   :  { %v1272_v17 = vmul.f32 %v1246_v26, %v1224_v12  ;;  %v1268_v10 = vsel %vm1265_vm0, %v1267_v19, %v1263_v25  ;;  %v1485_v19 = vld [vmem:[#allocation3 + $0x28] sm:$0xff] }
 0x3bb   :  { %v1275_v21 = vsub.f32 1.0, %v1268_v10  ;;  %v1277_v18 = vmul.f32 %v1268_v10, %v2982_v7  ;;  %v2327_v7 = vld [vmem:[%s3283_s14 + $0x18] sm:$0xff] }
 0x3bc   :  { %v1273_v4 = vadd.f32 %v1272_v17, %v1271_v14 }
 0x3be   :  { %2284 = vtanh.f32 %v1273_v4  ;;  %v1463_v4 = vld [vmem:[#allocation2 + $0x28] sm:$0xff] }
 0x3c4   :  { %v2285_v11 = vpop.eup %2284 }
 0x3c5   :  { %v1276_v16 = vmul.f32 %v2285_v11, %v1275_v21 }
 0x3c7   :  { %v3017_v20 = vadd.f32 %v1277_v18, %v1276_v16 }
 0x3c9   :  { %1280 = vst.msk [vmem:[#allocation5 + $0x18] sm:$0xff] %vm576_vm4, %v3017_v20  ;;  %2177 = vmatmul.msk.f32.vlgmr.msra.gmra.mxu0 %vm576_vm4, %v3017_v20  ;;  %2178 = vmatmul.msk.f32.vlgmr.msrb.gmra.mxu2 %vm576_vm4, %v3017_v20 }
 0x3ca   :  { %2179 = vmatmul.msk.f32.vlgmr.msrb.gmra.mxu3 %vm576_vm4, %v3017_v20  ;;  %1572 = vmatpush.msra.mxu0 %v3030_v37 }
 0x3cb   :  { %1650 = vmatpush.msrb.mxu2 %v2327_v7  ;;  %1670 = vmatpush.msrb.mxu3 %v2328_v24  ;;  %v1776_v24 = vld [vmem:[%s3291_s22 + $0x18] sm:$0xff] }
 0x3cc   :  { %1573 = vmatpush.msra.mxu0 %v3042_v27 }
 0x3cd   :  { %1651 = vmatpush.msrb.mxu2 %v2330_v22  ;;  %1671 = vmatpush.msrb.mxu3 %v2331_v28  ;;  %v1774_v22 = vld [vmem:[%s3291_s22 + $0x8] sm:$0xff]  ;;  %v1773_v28 = vld [vmem:[%s3291_s22] sm:$0xff] }
 0x3ce   :  { %1574 = vmatpush.msra.mxu0 %v3054_v29 }
 0x3cf   :  { %1652 = vmatpush.msrb.mxu2 %v2333_v32  ;;  %1672 = vmatpush.msrb.mxu3 %v2334_v39 }
 0x3d0   :  { %1575 = vmatpush.msra.mxu0 %v3066_v40 }
 0x3d1   :  { %1653 = vmatpush.msrb.mxu2 %v2336_v38  ;;  %1673 = vmatpush.msrb.mxu3 %v2337_v41 }
 0x446   :  { %v1301_v42 = vpop.f32.mrf.mxu0 }
 0x447   :  { %v1346_v43 = vadd.f32 %v1345_v55, %v1301_v42 }
 0x449   :  { %v2180_v44 = vmul.f32 -1.442695, %v1346_v43 }
 0x44b   :  { %2286 = vpow2.f32 %v2180_v44 }
 0x44c   :  { %v1321_v45 = vpop.f32.mrf.mxu2 }
 0x44d   :  { %v1368_v36 = vadd.f32 %v1367_v30, %v1321_v45  ;;  %v1341_v34 = vpop.f32.mrf.mxu3 }
 0x44e   :  { %v1342_v0 = vadd.f32 %v2806_v1, %v1341_v34 }
 0x44f   :  { %v2181_v46 = vmul.f32 -1.442695, %v1368_v36 }
 0x451   :  { %v2287_v47 = vpop.eup %2286  ;;  %2288 = vpow2.f32 %v2181_v46  ;;  %v3106_v46 = vld [vmem:[%s3286_s17] ss:$0 sm:$0xff] }
 0x452   :  { %v1350_v48 = vadd.f32 1.0, %v2287_v47 }
 0x454   :  { %2290 = vrcp.f32 %v1350_v48  ;;  %v1362_v53 = vand.u32 2147483648, %v1350_v48  ;;  %v1360_v56 = vand.u32 2147483647, %v1350_v48  ;;  %vm1356_vm1 = vweird.f32 %v1350_v48 }
 0x456   :  { %v1363_v35 = vor.u32 1.1754944e-38, %v1362_v53  ;;  %vm1361_vm10 = vcmp.eq.f32.partialorder %v1360_v56, 8.507059e+37  ;;  %v1507_v53 = vld [vmem:[#allocation4 + $0x28] sm:$0xff] }
 0x457   :  { %v2289_v49 = vpop.eup %2288 }
 0x458   :  { %v1372_v50 = vadd.f32 1.0, %v2289_v49 }
 0x45a   :  { %v2291_v33 = vpop.eup %2290  ;;  %2292 = vrcp.f32 %v1372_v50  ;;  %v1384_v5 = vand.u32 2147483648, %v1372_v50  ;;  %v1382_v57 = vand.u32 2147483647, %v1372_v50  ;;  %vm1378_vm12 = vweird.f32 %v1372_v50 }
 0x45b   :  { %v1352_v51 = vmul.f32 %v2291_v33, %v1350_v48  ;;  %vm1357_vm2 = vweird.f32 %v2291_v33 }
 0x45c   :  { %vm1358_vm9 = vmor %vm1356_vm1, %vm1357_vm2  ;;  %v1385_v12 = vor.u32 1.1754944e-38, %v1384_v5  ;;  %vm1383_vm14 = vcmp.eq.f32.partialorder %v1382_v57, 8.507059e+37  ;;  %v1764_v5 = vld [vmem:[#allocation6 + $0x18] sm:$0xff]  ;;  %v1766_v57 = vld [vmem:[#allocation6 + $0x28] sm:$0xff] }
 0x45d   :  { %v1353_v52 = vsub.f32 1.0, %v1352_v51 }
 0x45f   :  { %v1354_v54 = vmul.f32 %v2291_v33, %v1353_v52 }
 0x460   :  { %v2293_v13 = vpop.eup %2292 }
 0x461   :  { %v1374_v60 = vmul.f32 %v2293_v13, %v1372_v50  ;;  %v1355_v61 = vadd.f32 %v2291_v33, %v1354_v54  ;;  %vm1379_vm11 = vweird.f32 %v2293_v13 }
 0x462   :  { %vm1380_vm13 = vmor %vm1378_vm12, %vm1379_vm11 }
 0x463   :  { %v1375_v62 = vsub.f32 1.0, %v1374_v60  ;;  %v1359_v2 = vsel %vm1358_vm9, %v2291_v33, %v1355_v61 }
 0x464   :  { %v1364_v6 = vsel %vm1361_vm10, %v1363_v35, %v1359_v2  ;;  %v1761_v2 = vld [vmem:[#allocation6] sm:$0xff] }
 0x465   :  { %v1376_v3 = vmul.f32 %v2293_v13, %v1375_v62  ;;  %v1390_v9 = vmul.f32 %v1364_v6, %v1342_v0  ;;  %v1762_v6 = vld [vmem:[#allocation6 + $0x8] sm:$0xff] }
 0x467   :  { %v1377_v58 = vadd.f32 %v2293_v13, %v1376_v3  ;;  %v1391_v15 = vadd.f32 %v1390_v9, %v1389_v8  ;;  %v1763_v3 = vld [vmem:[#allocation6 + $0x10] sm:$0xff]  ;;  %v1765_v9 = vld [vmem:[#allocation6 + $0x20] sm:$0xff] }
 0x468   :  { %v1767_v8 = vld [vmem:[#allocation6 + $0x30] sm:$0xff] }
 0x469   :  { %v1381_v23 = vsel %vm1380_vm13, %v2293_v13, %v1377_v58  ;;  %2294 = vtanh.f32 %v1391_v15  ;;  %v1768_v58 = vld [vmem:[#allocation6 + $0x38] sm:$0xff] }
 0x46a   :  { %v1386_v26 = vsel %vm1383_vm14, %v1385_v12, %v1381_v23  ;;  %v1603_v12 = vld [vmem:[#allocation3 + $0x30] sm:$0xff] }
 0x46b   :  { %v1393_v63 = vsub.f32 1.0, %v1386_v26  ;;  %v1395_v59 = vmul.f32 %v1386_v26, %v3017_v20 }
 0x46f   :  { %v2295_v1 = vpop.eup %2294 }
 0x470   :  { %v1394_v17 = vmul.f32 %v2295_v1, %v1393_v63  ;;  %v1581_v1 = vld [vmem:[#allocation2 + $0x30] sm:$0xff] }
 0x472   :  { %v3077_v31 = vadd.f32 %v1395_v59, %v1394_v17 }
 0x474   :  { %1398 = vst.msk [vmem:[#allocation5 + $0x20] sm:$0xff] %vm576_vm4, %v3077_v31  ;;  %2182 = vmatmul.msk.f32.vlgmr.msrb.gmra.mxu1 %vm576_vm4, %v3077_v31  ;;  %2183 = vmatmul.msk.f32.vlgmr.msrb.gmra.mxu0 %vm576_vm4, %v3077_v31 }
 0x475   :  { %2184 = vmatmul.msk.f32.vlgmr.msra.gmra.mxu2 %vm576_vm4, %v3077_v31  ;;  %1690 = vmatpush.msrb.mxu1 %v3030_v37 }
 0x476   :  { %1813 = vmatpush.msrb.mxu0 %v1776_v24 }
 0x477   :  { %1691 = vmatpush.msrb.mxu1 %v3042_v27  ;;  %v1775_v27 = vld [vmem:[%s3291_s22 + $0x10] sm:$0xff] }
 0x478   :  { %1814 = vmatpush.msrb.mxu0 %v1775_v27 }
 0x479   :  { %1692 = vmatpush.msrb.mxu1 %v3054_v29 }
 0x47a   :  { %1815 = vmatpush.msrb.mxu0 %v1774_v22 }
 0x47b   :  { %1693 = vmatpush.msrb.mxu1 %v3066_v40 }
 0x47c   :  { %1816 = vmatpush.msrb.mxu0 %v1773_v28 }
 0x4f1   :  { %v1419_v14 = vpop.f32.mrf.mxu1  ;;  %v1439_v25 = vpop.f32.mrf.mxu0 }
 0x4f2   :  { %v1464_v10 = vadd.f32 %v1463_v4, %v1419_v14  ;;  %v1486_v21 = vadd.f32 %v1485_v19, %v1439_v25 }
 0x4f4   :  { %v2185_v11 = vmul.f32 -1.442695, %v1464_v10  ;;  %v2186_v16 = vmul.f32 -1.442695, %v1486_v21  ;;  %v1772_v10 = vld [vmem:[%s3292_s21 + $0x18] sm:$0xff]  ;;  %v1771_v21 = vld [vmem:[%s3292_s21 + $0x10] sm:$0xff] }
 0x4f5   :  { %1878 = vmatpush.msra.mxu2 %v1772_v10 }
 0x4f6   :  { %2296 = vpow2.f32 %v2185_v11 }
 0x4f7   :  { %2298 = vpow2.f32 %v2186_v16  ;;  %1879 = vmatpush.msra.mxu2 %v1771_v21  ;;  %v1770_v16 = vld [vmem:[%s3292_s21 + $0x8] sm:$0xff] }
 0x4f8   :  { %v1459_v45 = vpop.f32.mrf.mxu2 }
 0x4f9   :  { %v1460_v47 = vadd.f32 %v3106_v46, %v1459_v45  ;;  %1880 = vmatpush.msra.mxu2 %v1770_v16 }
 0x4fc   :  { %v2297_v18 = vpop.eup %2296 }
 0x4fd   :  { %v2299_v20 = vpop.eup %2298  ;;  %v1468_v7 = vadd.f32 1.0, %v2297_v18  ;;  %v1769_v18 = vld [vmem:[%s3292_s21] sm:$0xff] }
 0x4fe   :  { %v1490_v37 = vadd.f32 1.0, %v2299_v20  ;;  %1881 = vmatpush.msra.mxu2 %v1769_v18 }
 0x4ff   :  { %2300 = vrcp.f32 %v1468_v7  ;;  %v1480_v42 = vand.u32 2147483648, %v1468_v7  ;;  %v1478_v43 = vand.u32 2147483647, %v1468_v7  ;;  %vm1474_vm3 = vweird.f32 %v1468_v7 }
 0x500   :  { %2302 = vrcp.f32 %v1490_v37  ;;  %v1502_v33 = vand.u32 2147483648, %v1490_v37  ;;  %vm1496_vm8 = vweird.f32 %v1490_v37  ;;  %v1500_v52 = vand.u32 2147483647, %v1490_v37 }
 0x501   :  { %v1481_v36 = vor.u32 1.1754944e-38, %v1480_v42  ;;  %vm1479_vm6 = vcmp.eq.f32.partialorder %v1478_v43, 8.507059e+37 }
 0x502   :  { %v1503_v13 = vor.u32 1.1754944e-38, %v1502_v33  ;;  %vm1501_vm2 = vcmp.eq.f32.partialorder %v1500_v52, 8.507059e+37 }
 0x505   :  { %v2301_v29 = vpop.eup %2300 }
 0x506   :  { %v2303_v32 = vpop.eup %2302  ;;  %v1470_v39 = vmul.f32 %v2301_v29, %v1468_v7  ;;  %vm1475_vm15 = vweird.f32 %v2301_v29 }
 0x507   :  { %v1492_v40 = vmul.f32 %v2303_v32, %v1490_v37  ;;  %vm1476_vm5 = vmor %vm1474_vm3, %vm1475_vm15  ;;  %vm1497_vm7 = vweird.f32 %v2303_v32  ;;  %vm1939_vm3 = vcmask 523264  }
 0x508   :  { %v1471_v38 = vsub.f32 1.0, %v1470_v39  ;;  %vm1498_vm0 = vmor %vm1496_vm8, %vm1497_vm7 }
 0x509   :  { %v1493_v41 = vsub.f32 1.0, %v1492_v40 }
 0x50a   :  { %v1472_v55 = vmul.f32 %v2301_v29, %v1471_v38 }
 0x50b   :  { %v1494_v44 = vmul.f32 %v2303_v32, %v1493_v41 }
 0x50c   :  { %v1473_v30 = vadd.f32 %v2301_v29, %v1472_v55 }
 0x50d   :  { %v1495_v49 = vadd.f32 %v2303_v32, %v1494_v44 }
 0x50e   :  { %v1477_v48 = vsel %vm1476_vm5, %v2301_v29, %v1473_v30  ;;  %v1625_v30 = vld [vmem:[#allocation4 + $0x30] sm:$0xff] }
 0x50f   :  { %v1482_v50 = vsel %vm1479_vm6, %v1481_v36, %v1477_v48  ;;  %v1499_v56 = vsel %vm1498_vm0, %v2303_v32, %v1495_v49 }
 0x510   :  { %v1508_v51 = vmul.f32 %v1482_v50, %v1460_v47  ;;  %v1504_v34 = vsel %vm1501_vm2, %v1503_v13, %v1499_v56  ;;  %v1754_v56 = vld [vmem:[#allocation5 + $0x8] sm:$0xff]  ;;  %v1755_v13 = vld [vmem:[#allocation5 + $0x10] sm:$0xff] }
 0x511   :  { %v1511_v60 = vsub.f32 1.0, %v1504_v34  ;;  %v1513_v62 = vmul.f32 %v1504_v34, %v3077_v31  ;;  %v1756_v34 = vld [vmem:[#allocation5 + $0x18] sm:$0xff] }
 0x512   :  { %v1509_v54 = vadd.f32 %v1508_v51, %v1507_v53 }
 0x514   :  { %2304 = vtanh.f32 %v1509_v54  ;;  %v1753_v54 = vld [vmem:[#allocation5] sm:$0xff] }
 0x51a   :  { %v2305_v61 = vpop.eup %2304 }
 0x51b   :  { %v1512_v35 = vmul.f32 %v2305_v61, %v1511_v60  ;;  %v1757_v60 = vld [vmem:[#allocation5 + $0x20] sm:$0xff] }
 0x51d   :  { %v3110_v0 = vadd.f32 %v1513_v62, %v1512_v35  ;;  %v1934_v62 = vld [vmem:[%s3295_s24 + $0x38] sm:$0xff] }
 0x51f   :  { %1516 = vst.msk [vmem:[#allocation5 + $0x28] sm:$0xff] %vm576_vm4, %v3110_v0  ;;  %2187 = vmatmul.msk.f32.vlgmr.msra.gmra.mxu3 %vm576_vm4, %v3110_v0  ;;  %2188 = vmatmul.msk.f32.vlgmr.msra.gmra.mxu1 %vm576_vm4, %v3110_v0 }
 0x520   :  { %2189 = vmatmul.msk.f32.vlgmr.msra.gmra.mxu0 %vm576_vm4, %v3110_v0  ;;  %1972 = vmatpush.msra.mxu3 %v1934_v62  ;;  %v2018_v62 = vld [vmem:[%s3296_s26 + $0x28] sm:$0xff] }
 0x526   :  { %v1758_v61 = vld [vmem:[#allocation5 + $0x28] sm:$0xff] }
 0x528   :  { %2197 = vmatmul.msk.f32.vlgmr.msrb.gmra.mxu0 %vm576_vm4, %v1761_v2  ;;  %v1932_v2 = vld [vmem:[%s3295_s24 + $0x28] sm:$0xff] }
 0x530   :  { %2198 = vmatmul.msk.f32.gmra.mxu0 %vm576_vm4, %v1762_v6  ;;  %v1931_v6 = vld [vmem:[%s3295_s24 + $0x20] sm:$0xff] }
 0x538   :  { %2199 = vmatmul.msk.f32.gmra.mxu0 %vm576_vm4, %v1763_v3  ;;  %v1930_v3 = vld [vmem:[%s3295_s24 + $0x18] sm:$0xff] }
 0x540   :  { %2200 = vmatmul.msk.f32.gmra.mxu0 %vm576_vm4, %v1764_v5  ;;  %v1929_v5 = vld [vmem:[%s3295_s24 + $0x10] sm:$0xff] }
 0x548   :  { %2201 = vmatmul.msk.f32.gmra.mxu0 %vm576_vm4, %v1765_v9  ;;  %v1928_v9 = vld [vmem:[%s3295_s24 + $0x8] sm:$0xff] }
 0x550   :  { %2202 = vmatmul.msk.f32.gmra.mxu0 %vm576_vm4, %v1766_v57  ;;  %v1927_v57 = vld [vmem:[%s3295_s24] sm:$0xff] }
 0x558   :  { %2203 = vmatmul.msk.f32.gmra.mxu0 %vm576_vm4, %v1767_v8 }
 0x560   :  { %2204 = vmatmul.msk.f32.gmra.mxu0 %vm576_vm4, %v1768_v58 }
 0x59c   :  { %v1557_v15 = vpop.f32.mrf.mxu1 }
 0x59d   :  { %v1604_v23 = vadd.f32 %v1603_v12, %v1557_v15  ;;  %v1577_v32 = vpop.f32.mrf.mxu0  ;;  %v1699_v15 = vld [vmem:[#allocation2 + $0x38] sm:$0xff] }
 0x59e   :  { %v1578_v38 = vadd.f32 %v3106_v46, %v1577_v32 }
 0x59f   :  { %v2191_v26 = vmul.f32 -1.442695, %v1604_v23  ;;  %v1721_v23 = vld [vmem:[#allocation3 + $0x38] sm:$0xff] }
 0x5a1   :  { %2306 = vpow2.f32 %v2191_v26 }
 0x5a2   :  { %v1537_v63 = vpop.f32.mrf.mxu3 }
 0x5a3   :  { %v1582_v17 = vadd.f32 %v1581_v1, %v1537_v63 }
 0x5a5   :  { %v2190_v59 = vmul.f32 -1.442695, %v1582_v17  ;;  %v1818_v8 = vpop.f32.mrf.mxu0 }
 0x5a7   :  { %v2307_v31 = vpop.eup %2306  ;;  %2308 = vpow2.f32 %v2190_v59 }
 0x5a8   :  { %v1608_v14 = vadd.f32 1.0, %v2307_v31  ;;  %v3186_v31 = vld [vmem:[%s3293_s23] ss:$0 sm:$0xff] }
 0x5aa   :  { %2310 = vrcp.f32 %v1608_v14  ;;  %v1620_v43 = vand.u32 2147483648, %v1608_v14  ;;  %vm1614_vm13 = vweird.f32 %v1608_v14  ;;  %v1618_v45 = vand.u32 2147483647, %v1608_v14 }
 0x5ac   :  { %v1621_v48 = vor.u32 1.1754944e-38, %v1620_v43  ;;  %vm1619_vm15 = vcmp.eq.f32.partialorder %v1618_v45, 8.507059e+37 }
 0x5ad   :  { %v2309_v4 = vpop.eup %2308  ;;  %v1821_v59 = vpop.f32.mrf.mxu0 }
 0x5ae   :  { %v1586_v25 = vadd.f32 1.0, %v2309_v4 }
 0x5b0   :  { %2312 = vrcp.f32 %v1586_v25  ;;  %v2311_v19 = vpop.eup %2310  ;;  %v1598_v27 = vand.u32 2147483648, %v1586_v25  ;;  %v1596_v28 = vand.u32 2147483647, %v1586_v25  ;;  %vm1592_vm9 = vweird.f32 %v1586_v25 }
 0x5b1   :  { %v1610_v11 = vmul.f32 %v2311_v19, %v1608_v14  ;;  %vm1615_vm12 = vweird.f32 %v2311_v19 }
 0x5b2   :  { %v1599_v40 = vor.u32 1.1754944e-38, %v1598_v27  ;;  %vm1597_vm11 = vcmp.eq.f32.partialorder %v1596_v28, 8.507059e+37  ;;  %vm1616_vm14 = vmor %vm1614_vm13, %vm1615_vm12 }
 0x5b3   :  { %v1611_v37 = vsub.f32 1.0, %v1610_v11 }
 0x5b5   :  { %v1612_v29 = vmul.f32 %v2311_v19, %v1611_v37  ;;  %v1824_v18 = vpop.f32.mrf.mxu0 }
 0x5b6   :  { %v2313_v20 = vpop.eup %2312 }
 0x5b7   :  { %v1588_v7 = vmul.f32 %v2313_v20, %v1586_v25  ;;  %vm1593_vm1 = vweird.f32 %v2313_v20  ;;  %v1613_v42 = vadd.f32 %v2311_v19, %v1612_v29 }
 0x5b8   :  { %vm1594_vm10 = vmor %vm1592_vm9, %vm1593_vm1 }
 0x5b9   :  { %v1589_v24 = vsub.f32 1.0, %v1588_v7  ;;  %v1617_v47 = vsel %vm1616_vm14, %v2311_v19, %v1613_v42 }
 0x5ba   :  { %v1622_v49 = vsel %vm1619_vm15, %v1621_v48, %v1617_v47 }
 0x5bb   :  { %v1590_v22 = vmul.f32 %v2313_v20, %v1589_v24  ;;  %v1629_v50 = vsub.f32 1.0, %v1622_v49  ;;  %v1631_v52 = vmul.f32 %v1622_v49, %v3110_v0  ;;  %v1933_v0 = vld [vmem:[%s3295_s24 + $0x30] sm:$0xff] }
 0x5bc   :  { %1973 = vmatpush.msra.mxu3 %v1933_v0 }
 0x5bd   :  { %v1591_v39 = vadd.f32 %v2313_v20, %v1590_v22  ;;  %v1827_v43 = vpop.f32.mrf.mxu0 }
 0x5be   :  { %1974 = vmatpush.msra.mxu3 %v1932_v2 }
 0x5bf   :  { %v1595_v41 = vsel %vm1594_vm10, %v2313_v20, %v1591_v39 }
 0x5c0   :  { %v1600_v55 = vsel %vm1597_vm11, %v1599_v40, %v1595_v41  ;;  %1975 = vmatpush.msra.mxu3 %v1931_v6 }
 0x5c1   :  { %v1626_v44 = vmul.f32 %v1600_v55, %v1578_v38 }
 0x5c2   :  { %1976 = vmatpush.msra.mxu3 %v1930_v3  ;;  %v2017_v3 = vld [vmem:[%s3296_s26 + $0x20] sm:$0xff] }
 0x5c3   :  { %v1627_v36 = vadd.f32 %v1626_v44, %v1625_v30 }
 0x5c4   :  { %1977 = vmatpush.msra.mxu3 %v1929_v5 }
 0x5c5   :  { %2314 = vtanh.f32 %v1627_v36  ;;  %v1830_v5 = vpop.f32.mrf.mxu0 }
 0x5c6   :  { %1978 = vmatpush.msra.mxu3 %v1928_v9 }
 0x5c8   :  { %1979 = vmatpush.msra.mxu3 %v1927_v57 }
 0x5cb   :  { %v2315_v33 = vpop.eup %2314 }
 0x5cc   :  { %v1630_v51 = vmul.f32 %v2315_v33, %v1629_v50 }
 0x5ce   :  { %v3142_v53 = vadd.f32 %v1631_v52, %v1630_v51 }
 0x5d0   :  { %1634 = vst.msk [vmem:[#allocation5 + $0x30] sm:$0xff] %vm576_vm4, %v3142_v53  ;;  %2192 = vmatmul.msk.f32.vlgmr.msrb.gmra.mxu2 %vm576_vm4, %v3142_v53  ;;  %2193 = vmatmul.msk.f32.vlgmr.msrb.gmra.mxu3 %vm576_vm4, %v3142_v53 }
 0x5d1   :  { %2194 = vmatmul.msk.f32.vlgmr.msrb.gmra.mxu1 %vm576_vm4, %v3142_v53 }
 0x5d7   :  { %v1759_v35 = vld [vmem:[#allocation5 + $0x30] sm:$0xff] }
 0x5d8   :  { %2205 = vmatmul.msk.f32.vlgmr.msra.gmra.mxu2 %vm576_vm4, %v1753_v54 }
 0x5e0   :  { %2206 = vmatmul.msk.f32.gmra.mxu2 %vm576_vm4, %v1754_v56  ;;  %v2020_v56 = vld [vmem:[%s3296_s26 + $0x38] sm:$0xff] }
 0x5e1   :  { %2057 = vmatpush.msra.mxu1 %v2020_v56 }
 0x5e8   :  { %2207 = vmatmul.msk.f32.gmra.mxu2 %vm576_vm4, %v1755_v13  ;;  %v2019_v13 = vld [vmem:[%s3296_s26 + $0x30] sm:$0xff] }
 0x5e9   :  { %2058 = vmatpush.msra.mxu1 %v2019_v13 }
 0x5eb   :  { %2059 = vmatpush.msra.mxu1 %v2018_v62 }
 0x5ed   :  { %2060 = vmatpush.msra.mxu1 %v2017_v3 }
 0x5f0   :  { %2208 = vmatmul.msk.f32.gmra.mxu2 %vm576_vm4, %v1756_v34  ;;  %v1743_v34 = vld [vmem:[#allocation4 + $0x38] sm:$0xff] }
 0x5f8   :  { %2209 = vmatmul.msk.f32.gmra.mxu2 %vm576_vm4, %v1757_v60 }
 0x600   :  { %2210 = vmatmul.msk.f32.gmra.mxu2 %vm576_vm4, %v1758_v61 }
 0x608   :  { %2211 = vmatmul.msk.f32.gmra.mxu2 %vm576_vm4, %v1759_v35 }
 0x64e   :  { %v1695_v44 = vpop.f32.mrf.mxu1 }
 0x64f   :  { %v1696_v48 = vadd.f32 %v3106_v46, %v1695_v44 }
 0x653   :  { %v1655_v58 = vpop.f32.mrf.mxu2  ;;  %v1675_v12 = vpop.f32.mrf.mxu3 }
 0x654   :  { %v1700_v26 = vadd.f32 %v1699_v15, %v1655_v58  ;;  %v1722_v63 = vadd.f32 %v1721_v23, %v1675_v12 }
 0x656   :  { %v2195_v1 = vmul.f32 -1.442695, %v1700_v26  ;;  %v2196_v17 = vmul.f32 -1.442695, %v1722_v63 }
 0x658   :  { %2316 = vpow2.f32 %v2195_v1 }
 0x659   :  { %2318 = vpow2.f32 %v2196_v17 }
 0x65b   :  { %v1883_v14 = vpop.f32.mrf.mxu2 }
 0x65c   :  { %v1884_v4 = vadd.f32 %v1883_v14, %v1818_v8  ;;  %v2016_v8 = vld [vmem:[%s3296_s26 + $0x18] sm:$0xff]  ;;  %v1833_v14 = vpop.f32.mrf.mxu0 }
 0x65d   :  { %2061 = vmatpush.msra.mxu1 %v2016_v8 }
 0x65e   :  { %v2317_v25 = vpop.eup %2316  ;;  %v1911_v19 = vadd.f32 %v3186_v31, %v1884_v4 }
 0x65f   :  { %v2319_v10 = vpop.eup %2318  ;;  %v1704_v21 = vadd.f32 1.0, %v2317_v25 }
 0x660   :  { %v1726_v11 = vadd.f32 1.0, %v2319_v10  ;;  %v1919_v16 = vmax.f32 %v1911_v19, 0.0 }
 0x661   :  { %2320 = vrcp.f32 %v1704_v21  ;;  %v1716_v39 = vand.u32 2147483648, %v1704_v21  ;;  %v1714_v42 = vand.u32 2147483647, %v1704_v21  ;;  %vm1710_vm6 = vweird.f32 %v1704_v21 }
 0x662   :  { %2322 = vrcp.f32 %v1726_v11  ;;  %2213 = vmatmul.msk.f32.vlgmr.msra.gmra.mxu3 %vm1939_vm3, %v1919_v16  ;;  %v1738_v54 = vand.u32 2147483648, %v1726_v11  ;;  %vm1732_vm2 = vweird.f32 %v1726_v11  ;;  %v1736_v46 = vand.u32 2147483647, %v1726_v11 }
 0x663   :  { %v1886_v20 = vpop.f32.mrf.mxu2  ;;  %v1717_v47 = vor.u32 1.1754944e-38, %v1716_v39  ;;  %vm1715_vm8 = vcmp.eq.f32.partialorder %v1714_v42, 8.507059e+37 }
 0x664   :  { %v1887_v7 = vadd.f32 %v1886_v20, %v1821_v59  ;;  %v1739_v2 = vor.u32 1.1754944e-38, %v1738_v54  ;;  %vm1737_vm9 = vcmp.eq.f32.partialorder %v1736_v46, 8.507059e+37  ;;  %v2245_v46 = vld [vmem:[%s3297_s27] ss:$0 sm:$0xff] }
 0x666   :  { %v1912_v37 = vadd.f32 %v3186_v31, %v1887_v7  ;;  %v2015_v7 = vld [vmem:[%s3296_s26 + $0x10] sm:$0xff] }
 0x667   :  { %v2321_v24 = vpop.eup %2320  ;;  %2062 = vmatpush.msra.mxu1 %v2015_v7 }
 0x668   :  { %v2323_v27 = vpop.eup %2322  ;;  %v1706_v22 = vmul.f32 %v2321_v24, %v1704_v21  ;;  %v1920_v28 = vmax.f32 %v1912_v37, 0.0  ;;  %vm1711_vm5 = vweird.f32 %v2321_v24  ;;  %v2014_v37 = vld [vmem:[%s3296_s26 + $0x8] sm:$0xff] }
 0x669   :  { %v1728_v29 = vmul.f32 %v2323_v27, %v1726_v11  ;;  %vm1712_vm7 = vmor %vm1710_vm6, %vm1711_vm5  ;;  %vm1733_vm0 = vweird.f32 %v2323_v27  ;;  %2063 = vmatpush.msra.mxu1 %v2014_v37 }
 0x66a   :  { %v1707_v32 = vsub.f32 1.0, %v1706_v22  ;;  %2214 = vmatmul.msk.f32.gmra.mxu3 %vm1939_vm3, %v1920_v28  ;;  %vm1734_vm1 = vmor %vm1732_vm2, %vm1733_vm0 }
 0x66b   :  { %v1729_v40 = vsub.f32 1.0, %v1728_v29  ;;  %v1889_v38 = vpop.f32.mrf.mxu2 }
 0x66c   :  { %v1708_v41 = vmul.f32 %v2321_v24, %v1707_v32  ;;  %v1890_v55 = vadd.f32 %v1889_v38, %v1824_v18 }
 0x66d   :  { %v1730_v45 = vmul.f32 %v2323_v27, %v1729_v40 }
 0x66e   :  { %v1709_v30 = vadd.f32 %v2321_v24, %v1708_v41  ;;  %v1913_v36 = vadd.f32 %v3186_v31, %v1890_v55 }
 0x66f   :  { %v1731_v51 = vadd.f32 %v2323_v27, %v1730_v45 }
 0x670   :  { %v1713_v49 = vsel %vm1712_vm7, %v2321_v24, %v1709_v30  ;;  %v1921_v50 = vmax.f32 %v1913_v36, 0.0  ;;  %v2013_v24 = vld [vmem:[%s3296_s26] sm:$0xff] }
 0x671   :  { %v1718_v33 = vsel %vm1715_vm8, %v1717_v47, %v1713_v49  ;;  %v1735_v0 = vsel %vm1734_vm1, %v2323_v27, %v1731_v51  ;;  %2064 = vmatpush.msra.mxu1 %v2013_v24  ;;  %v2244_v27 = vld [vmem:[%s3294_s25] ss:$0 sm:$0xff] }
 0x672   :  { %v1744_v52 = vmul.f32 %v1718_v33, %v1696_v48  ;;  %2215 = vmatmul.msk.f32.gmra.mxu3 %vm1939_vm3, %v1921_v50  ;;  %v1740_v9 = vsel %vm1737_vm9, %v1739_v2, %v1735_v0 }
 0x673   :  { %v1892_v60 = vpop.f32.mrf.mxu2  ;;  %v1747_v58 = vsub.f32 1.0, %v1740_v9  ;;  %v1749_v63 = vmul.f32 %v1740_v9, %v3142_v53  ;;  %v1836_v53 = vpop.f32.mrf.mxu0 }
 0x674   :  { %v1745_v61 = vadd.f32 %v1744_v52, %v1743_v34  ;;  %v1893_v35 = vadd.f32 %v1892_v60, %v1827_v43 }
 0x676   :  { %2324 = vtanh.f32 %v1745_v61  ;;  %v1914_v6 = vadd.f32 %v3186_v31, %v1893_v35 }
 0x678   :  { %v1922_v57 = vmax.f32 %v1914_v6, 0.0 }
 0x67a   :  { %2216 = vmatmul.msk.f32.gmra.mxu3 %vm1939_vm3, %v1922_v57 }
 0x67b   :  { %v1895_v15 = vpop.f32.mrf.mxu2  ;;  %v1839_v47 = vpop.f32.mrf.mxu0 }
 0x67c   :  { %v2325_v12 = vpop.eup %2324  ;;  %v1896_v23 = vadd.f32 %v1895_v15, %v1830_v5 }
 0x67d   :  { %v1748_v26 = vmul.f32 %v2325_v12, %v1747_v58 }
 0x67e   :  { %v1915_v1 = vadd.f32 %v3186_v31, %v1896_v23 }
 0x67f   :  { %v1750_v17 = vadd.f32 %v1749_v63, %v1748_v26 }
 0x680   :  { %v1923_v59 = vmax.f32 %v1915_v1, 0.0 }
 0x681   :  { %1752 = vst.msk [vmem:[#allocation5 + $0x38] sm:$0xff] %vm576_vm4, %v1750_v17 }
 0x682   :  { %2217 = vmatmul.msk.f32.gmra.mxu3 %vm1939_vm3, %v1923_v59 }
 0x683   :  { %v1898_v4 = vpop.f32.mrf.mxu2 }
 0x684   :  { %v1899_v25 = vadd.f32 %v1898_v4, %v1833_v14 }
 0x686   :  { %v1916_v19 = vadd.f32 %v3186_v31, %v1899_v25 }
 0x688   :  { %v1924_v10 = vmax.f32 %v1916_v19, 0.0  ;;  %v1760_v21 = vld [vmem:[#allocation5 + $0x38] sm:$0xff] }
 0x689   :  { %2212 = vmatmul.msk.f32.gmra.mxu2 %vm576_vm4, %v1760_v21 }
 0x68a   :  { %2218 = vmatmul.msk.f32.gmra.mxu3 %vm1939_vm3, %v1924_v10 }
 0x68b   :  { %v1901_v11 = vpop.f32.mrf.mxu2 }
 0x68c   :  { %v1902_v16 = vadd.f32 %v1901_v11, %v1836_v53 }
 0x68e   :  { %v1917_v18 = vadd.f32 %v3186_v31, %v1902_v16 }
 0x690   :  { %v1925_v20 = vmax.f32 %v1917_v18, 0.0 }
 0x692   :  { %2219 = vmatmul.msk.f32.gmra.mxu3 %vm1939_vm3, %v1925_v20 }
 0x6e5   :  { %v1981_v22 = vpop.f32.mrf.mxu3 }
 0x6e6   :  { %v1982_v28 = vadd.f32 %v2244_v27, %v1981_v22 }
 0x6e8   :  { %v2005_v29 = vmax.f32 %v1982_v28, 0.0 }
 0x6ea   :  { %2221 = vmatmul.msk.f32.vlgmr.msra.gmra.mxu1 %vm1939_vm3, %v2005_v29 }
 0x6ed   :  { %v1984_v32 = vpop.f32.mrf.mxu3 }
 0x6ee   :  { %v1985_v39 = vadd.f32 %v2244_v27, %v1984_v32 }
 0x6f0   :  { %v2006_v40 = vmax.f32 %v1985_v39, 0.0 }
 0x6f2   :  { %2222 = vmatmul.msk.f32.gmra.mxu1 %vm1939_vm3, %v2006_v40 }
 0x6f5   :  { %v1987_v38 = vpop.f32.mrf.mxu3 }
 0x6f6   :  { %v1988_v41 = vadd.f32 %v2244_v27, %v1987_v38 }
 0x6f8   :  { %v2007_v42 = vmax.f32 %v1988_v41, 0.0 }
 0x6fa   :  { %2223 = vmatmul.msk.f32.gmra.mxu1 %vm1939_vm3, %v2007_v42 }
 0x6fd   :  { %v1990_v55 = vpop.f32.mrf.mxu3 }
 0x6fe   :  { %v1991_v43 = vadd.f32 %v2244_v27, %v1990_v55 }
 0x700   :  { %v2008_v44 = vmax.f32 %v1991_v43, 0.0 }
 0x702   :  { %2224 = vmatmul.msk.f32.gmra.mxu1 %vm1939_vm3, %v2008_v44 }
 0x705   :  { %v1993_v45 = vpop.f32.mrf.mxu3 }
 0x706   :  { %v1994_v30 = vadd.f32 %v2244_v27, %v1993_v45 }
 0x708   :  { %v2009_v36 = vmax.f32 %v1994_v30, 0.0 }
 0x70a   :  { %2225 = vmatmul.msk.f32.gmra.mxu1 %vm1939_vm3, %v2009_v36 }
 0x70c   :  { %v1904_v48 = vpop.f32.mrf.mxu2 }
 0x70d   :  { %v1905_v49 = vadd.f32 %v1904_v48, %v1839_v47  ;;  %v1996_v50 = vpop.f32.mrf.mxu3 }
 0x70e   :  { %v1997_v33 = vadd.f32 %v2244_v27, %v1996_v50 }
 0x70f   :  { %v1918_v51 = vadd.f32 %v3186_v31, %v1905_v49 }
 0x710   :  { %v2010_v52 = vmax.f32 %v1997_v33, 0.0 }
 0x711   :  { %v1926_v54 = vmax.f32 %v1918_v51, 0.0 }
 0x712   :  { %2226 = vmatmul.msk.f32.gmra.mxu1 %vm1939_vm3, %v2010_v52 }
 0x713   :  { %2220 = vmatmul.msk.f32.gmra.mxu3 %vm1939_vm3, %v1926_v54 }
 0x715   :  { %v1999_v56 = vpop.f32.mrf.mxu3 }
 0x716   :  { %v2000_v13 = vadd.f32 %v2244_v27, %v1999_v56 }
 0x718   :  { %v2011_v34 = vmax.f32 %v2000_v13, 0.0 }
 0x71a   :  { %2227 = vmatmul.msk.f32.gmra.mxu1 %vm1939_vm3, %v2011_v34 }
 0x767   :  { %v2066_v60 = vpop.f32.mrf.mxu1 }
 0x768   :  { %v2067_v61 = vadd.f32 %v2245_v46, %v2066_v60 }
 0x76a   :  { %2090 = vst [vmem:[%s3298_s28] sm:$0xff] %v2067_v61 }
 0x76f   :  { %v2069_v31 = vpop.f32.mrf.mxu1 }
 0x770   :  { %v2070_v35 = vadd.f32 %v2245_v46, %v2069_v31 }
 0x772   :  { %2091 = vst [vmem:[%s3298_s28 + $0x8] sm:$0xff] %v2070_v35 }
 0x777   :  { %v2072_v62 = vpop.f32.mrf.mxu1 }
 0x778   :  { %v2073_v0 = vadd.f32 %v2245_v46, %v2072_v62 }
 0x77a   :  { %2092 = vst [vmem:[%s3298_s28 + $0x10] sm:$0xff] %v2073_v0 }
 0x77f   :  { %v2075_v2 = vpop.f32.mrf.mxu1 }
 0x780   :  { %v2076_v6 = vadd.f32 %v2245_v46, %v2075_v2 }
 0x782   :  { %2093 = vst [vmem:[%s3298_s28 + $0x18] sm:$0xff] %v2076_v6 }
 0x787   :  { %v2078_v3 = vpop.f32.mrf.mxu1 }
 0x788   :  { %v2079_v5 = vadd.f32 %v2245_v46, %v2078_v3 }
 0x78a   :  { %2094 = vst [vmem:[%s3298_s28 + $0x20] sm:$0xff] %v2079_v5 }
 0x78f   :  { %v2081_v9 = vpop.f32.mrf.mxu1 }
 0x790   :  { %v2082_v57 = vadd.f32 %v2245_v46, %v2081_v9 }
 0x792   :  { %2095 = vst [vmem:[%s3298_s28 + $0x28] sm:$0xff] %v2082_v57 }
 0x796   :  { %v2002_v8 = vpop.f32.mrf.mxu3 }
 0x797   :  { %v2003_v58 = vadd.f32 %v2244_v27, %v2002_v8  ;;  %v2084_v15 = vpop.f32.mrf.mxu1 }
 0x798   :  { %v2085_v12 = vadd.f32 %v2245_v46, %v2084_v15 }
 0x799   :  { %v2012_v23 = vmax.f32 %v2003_v58, 0.0 }
 0x79a   :  { %2096 = vst [vmem:[%s3298_s28 + $0x30] sm:$0xff] %v2085_v12 }
 0x79b   :  { %2228 = vmatmul.msk.f32.gmra.mxu1 %vm1939_vm3, %v2012_v23 }
 0x818   :  { %v2087_v26 = vpop.f32.mrf.mxu1 }
 0x819   :  { %v2088_v63 = vadd.f32 %v2245_v46, %v2087_v26 }
 0x81b   :  { %2097 = vst [vmem:[%s3298_s28 + $0x38] sm:$0xff] %v2088_v63 }

</bundles_post_ra>
